<compile_context>
chip_gen: v6e
topology: v6e:2x2x1
jax: 0.10.0
libtpu: 0.0.40
codegen_flags: <defaults>
</compile_context>

<pallas_src>
import numpy as np
import jax
import jax.numpy as jnp
from jax.experimental import pallas as pl
from jax.experimental.pallas import tpu as pltpu

LN_EPS = 1e-5        # torch.nn.LayerNorm default eps
COS_EPS = 1e-8       # torch cosine_similarity default eps
NEG_BIG = -1e30      # additive mask value (exp underflows to 0, like -inf)


def _cbow_loss_kernel(ec_ref, x_ref, y_ref, w_ref, b_ref, mask_ref, word_ref,
                      gamma_ref, beta_ref, out_ref):
    # ---------------- CBOW branch ----------------
    # bag-of-embeddings sum over entity + context rows
    embeds = jnp.sum(ec_ref[...], axis=1)                          # (TB, D)

    # LayerNorm over the last (lane) dim
    mean = jnp.mean(embeds, axis=-1, keepdims=True)
    var = jnp.mean((embeds - mean) ** 2, axis=-1, keepdims=True)
    normed = (embeds - mean) * jax.lax.rsqrt(var + LN_EPS)
    normed = normed * gamma_ref[...] + beta_ref[...]               # (TB, D)

    # Full-vocabulary logits on the MXU: normed @ W.T + b   ((TB,D)x(V,D)^T)
    logits = jax.lax.dot_general(
        normed, w_ref[...],
        dimension_numbers=(((1,), (1,)), ((), ())),
        preferred_element_type=jnp.float32) + b_ref[...]           # (TB, V)

    # masked log-softmax denominator; the word column is always un-masked so
    # the row max stays finite.
    masked = logits + mask_ref[...]                                # (TB, V)
    m = jnp.max(masked, axis=-1, keepdims=True)
    lse = jnp.log(jnp.sum(jnp.exp(masked - m), axis=-1, keepdims=True)) + m

    # extract logits[b, word[b]] with a lane-iota compare + lane reduce
    vid = jax.lax.broadcasted_iota(jnp.int32, logits.shape, 1)     # (TB, V)
    word_logit = jnp.sum(jnp.where(vid == word_ref[...], logits, 0.0),
                         axis=-1, keepdims=True)                   # (TB, 1)
    logp_word = word_logit - lse                                   # (TB, 1)

    # ---------------- KG branch ----------------
    x = x_ref[...]                                                 # (TB, T, D)  r + e1
    y = y_ref[...]                                                 # (TB, T, D)  e2
    num = jnp.sum(x * y, axis=-1)                                  # (TB, T)
    nx2 = jnp.sum(x * x, axis=-1)
    ny2 = jnp.sum(y * y, axis=-1)
    denom2 = (jnp.maximum(nx2, COS_EPS * COS_EPS)
              * jnp.maximum(ny2, COS_EPS * COS_EPS))
    cos = num * jax.lax.rsqrt(denom2)                              # (TB, T)
    cos_sum = jnp.sum(cos, axis=-1, keepdims=True)                 # (TB, 1)

    out_ref[...] = jnp.concatenate([logp_word, cos_sum], axis=-1)  # (TB, 2)


def _num_tensorcores() -> int:
    """2 on dual-TensorCore / megacore chips (v7x, v4, v5p), else 1."""
    try:
        kind = jax.devices()[0].device_kind.lower()
    except Exception:
        return 1
    if ("v7" in kind) or ("v4" in kind) or ("v5p" in kind):
        return 2
    return 1


def _pick_batch_tile(B: int, n_cores: int) -> int:
    """Single grid step on single-TC chips (no benefit, ~0.35us/step overhead);
    two even steps on dual-TC chips so both cores get one tile each."""
    if n_cores >= 2 and B % 2 == 0 and (B // 2) % 8 == 0:
        return B // 2
    return B


def cbow_model_forward(params, word, entities, contexts, negative, triplets):
    emb = params["embedding"]                  # (Vtot, D)
    W = params["linear_w"]                     # (V, D)
    bias = params["linear_b"]                  # (V,)
    V, D = W.shape
    gamma = params["ln_gamma"].reshape(1, D)
    beta = params["ln_beta"].reshape(1, D)
    bias2d = bias.reshape(1, V)

    B = word.shape[0]
    T = triplets.shape[1]

    # ---- glue: data-dependent embedding-row gathers stay in XLA (2 gathers) ----
    ec_idx = jnp.concatenate([entities, contexts], axis=1).astype(jnp.int32)
    ec_emb = jnp.take(emb, ec_idx, axis=0)                         # (B, Ne+Nc, D)
    trip_emb = jnp.take(emb, triplets.astype(jnp.int32), axis=0)   # (B, T, 3, D)
    x_emb = trip_emb[:, :, 1, :] + trip_emb[:, :, 0, :]            # r + e1 (fuses)
    y_emb = trip_emb[:, :, 2, :]                                   # e2

    # Additive softmax mask: 0 at allowed columns (word, negative, contexts),
    # NEG_BIG elsewhere (matches torch scatter semantics; duplicates are free).
    allowed = jnp.concatenate([word[:, None], negative, contexts],
                              axis=1).astype(jnp.int32)            # (B, K)
    vid = jnp.arange(V, dtype=jnp.int32)
    is_allowed = jnp.any(allowed[:, :, None] == vid[None, None, :], axis=1)
    addmask = jnp.where(is_allowed, 0.0, NEG_BIG).astype(jnp.float32)   # (B, V)

    word_col = word.astype(jnp.int32).reshape(B, 1)

    EC = ec_emb.shape[1]
    TB = _pick_batch_tile(B, _num_tensorcores())
    grid = (B // TB,)

    bmap3 = lambda i: (i, 0, 0)
    bmap2 = lambda i: (i, 0)
    cmap = lambda i: (0, 0)

    flops = int(2 * B * EC * D + 10 * B * D + 2 * B * D * V + 6 * B * V
                + 8 * B * T * D)
    transcendentals = int(B * (V + 1 + T))
    bytes_accessed = int(4 * (B * EC * D + 2 * B * T * D + V * D + V
                              + B * V + B + 2 * D + 2 * B))

    packed = pl.pallas_call(
        _cbow_loss_kernel,
        out_shape=jax.ShapeDtypeStruct((B, 2), jnp.float32),
        grid=grid,
        in_specs=[
            pl.BlockSpec((TB, EC, D), bmap3),   # entity+context embeddings
            pl.BlockSpec((TB, T, D), bmap3),    # r + e1
            pl.BlockSpec((TB, T, D), bmap3),    # e2
            pl.BlockSpec((V, D), cmap),         # linear weight (resident)
            pl.BlockSpec((1, V), cmap),         # linear bias   (resident)
            pl.BlockSpec((TB, V), bmap2),       # additive softmax mask
            pl.BlockSpec((TB, 1), bmap2),       # word index per row
            pl.BlockSpec((1, D), cmap),         # LN gamma (resident)
            pl.BlockSpec((1, D), cmap),         # LN beta  (resident)
        ],
        out_specs=pl.BlockSpec((TB, 2), bmap2),
        compiler_params=pltpu.CompilerParams(
            dimension_semantics=("parallel",)),
        cost_estimate=pl.CostEstimate(flops=flops,
                                      transcendentals=transcendentals,
                                      bytes_accessed=bytes_accessed),
    )(ec_emb, x_emb, y_emb, W, bias2d, addmask, word_col, gamma, beta)

    # Final O(B) reductions (glue).
    loss_cbow = -jnp.sum(packed[:, 0]) / B
    mean_cos = jnp.sum(packed[:, 1]) / (B * T)
    loss_kgs = -jax.nn.log_sigmoid(mean_cos)
    return loss_cbow, loss_kgs


def reference_forward(params, word, entities, contexts, negative, triplets):
    """Pure-JAX reference mirroring the PyTorch forward."""
    emb = params["embedding"]
    embeds = emb[entities].sum(1) + emb[contexts].sum(1)
    mean = embeds.mean(-1, keepdims=True)
    var = ((embeds - mean) ** 2).mean(-1, keepdims=True)
    out = (embeds - mean) / jnp.sqrt(var + LN_EPS)
    out = out * params["ln_gamma"] + params["ln_beta"]
    out = out @ params["linear_w"].T + params["linear_b"]
    B = out.shape[0]
    mask = jnp.ones_like(out, dtype=bool)
    b_idx = jnp.arange(B)[:, None]
    mask = mask.at[b_idx, negative].set(False)
    mask = mask.at[b_idx, contexts].set(False)
    mask = mask.at[jnp.arange(B), word].set(False)
    masked = jnp.where(mask, -jnp.inf, out)
    logp = jax.nn.log_softmax(masked, axis=1)
    loss_cbow = -jnp.mean(logp[jnp.arange(B), word])
    r = emb[triplets[:, :, 1]]
    e1 = emb[triplets[:, :, 0]]
    e2 = emb[triplets[:, :, 2]]
    x = r + e1
    cos = jnp.sum(x * e2, -1) / (
        jnp.maximum(jnp.linalg.norm(x, axis=-1), COS_EPS)
        * jnp.maximum(jnp.linalg.norm(e2, axis=-1), COS_EPS))
    loss_kgs = -jax.nn.log_sigmoid(jnp.mean(cos))
    return loss_cbow, loss_kgs


if __name__ == "__main__":
    # V = vocab + ent + rel + 1 = 256, D = 128 (lane-dense).
    vocabulary_size, ent_size, rel_size = 200, 40, 15
    embedding_dim = 128
    V = vocabulary_size + ent_size + rel_size + 1
    B, Ne, Nc, Nn, Nt = 32, 3, 4, 5, 6

    key = jax.random.PRNGKey(0)
    ks = jax.random.split(key, 9)
    initrange = 1.0 / np.sqrt(embedding_dim)

    emb = jax.random.normal(ks[0], (V, embedding_dim), jnp.float32)
    emb = emb.at[V - 1].set(0.0)                      # padding_idx row
    params = dict(
        embedding=emb,
        linear_w=jax.random.uniform(ks[1], (V, embedding_dim), jnp.float32,
                                    -initrange, initrange),
        linear_b=jax.random.uniform(ks[2], (V,), jnp.float32,
                                    -initrange, initrange),
        ln_gamma=jnp.ones((embedding_dim,), jnp.float32),
        ln_beta=jnp.zeros((embedding_dim,), jnp.float32),
    )

    ent_lo, ent_hi = vocabulary_size, vocabulary_size + ent_size
    rel_lo, rel_hi = ent_hi, ent_hi + rel_size
    word = jax.random.randint(ks[3], (B,), 0, vocabulary_size, dtype=jnp.int32)
    entities = jax.random.randint(ks[4], (B, Ne), ent_lo, ent_hi, dtype=jnp.int32)
    contexts = jax.random.randint(ks[5], (B, Nc), 0, vocabulary_size, dtype=jnp.int32)
    negative = jax.random.randint(ks[6], (B, Nn), 0, vocabulary_size, dtype=jnp.int32)
    tr_e = jax.random.randint(ks[7], (B, Nt, 2), ent_lo, ent_hi, dtype=jnp.int32)
    tr_r = jax.random.randint(ks[8], (B, Nt, 1), rel_lo, rel_hi, dtype=jnp.int32)
    triplets = jnp.concatenate([tr_e[:, :, :1], tr_r, tr_e[:, :, 1:]], axis=2)

    loss_cbow, loss_kgs = jax.jit(cbow_model_forward)(
        params, word, entities, contexts, negative, triplets)
    jax.block_until_ready((loss_cbow, loss_kgs))

    ref_cbow, ref_kgs = reference_forward(
        params, word, entities, contexts, negative, triplets)
    assert np.allclose(float(loss_cbow), float(ref_cbow), rtol=1e-3, atol=1e-3), \
        (float(loss_cbow), float(ref_cbow))
    assert np.allclose(float(loss_kgs), float(ref_kgs), rtol=1e-3, atol=1e-3), \
        (float(loss_kgs), float(ref_kgs))

    print("KERNEL_OK")
</pallas_src>

<mosaic_0001>
module attributes {stable_mosaic.version = 11 : i64} {
  func.func @_cbow_loss_kernel(%arg0: i32, %arg1: memref<32x7x128xf32, #tpu.memory_space<vmem>>, %arg2: memref<32x6x128xf32, #tpu.memory_space<vmem>>, %arg3: memref<32x6x128xf32, #tpu.memory_space<vmem>>, %arg4: memref<256x128xf32, #tpu.memory_space<vmem>>, %arg5: memref<1x256xf32, #tpu.memory_space<vmem>>, %arg6: memref<32x256xf32, #tpu.memory_space<vmem>>, %arg7: memref<32x1xi32, #tpu.memory_space<vmem>>, %arg8: memref<1x128xf32, #tpu.memory_space<vmem>>, %arg9: memref<1x128xf32, #tpu.memory_space<vmem>>, %arg10: memref<32x2xf32, #tpu.memory_space<vmem>>) attributes {dimension_semantics = [#tpu.dimension_semantics<parallel>], iteration_bounds = array<i64: 1>, scalar_prefetch = 0 : i64, scratch_operands = 0 : i64, tpu.core_type = #tpu.core_type<tc>, window_params = [{transform_indices = @transform_0, window_bounds = array<i64: 32, 7, 128>}, {transform_indices = @transform_1, window_bounds = array<i64: 32, 6, 128>}, {transform_indices = @transform_2, window_bounds = array<i64: 32, 6, 128>}, {pipeline_mode = #tpu.pipeline_mode<synchronous>, transform_indices = @transform_3, window_bounds = array<i64: 256, 128>}, {pipeline_mode = #tpu.pipeline_mode<synchronous>, transform_indices = @transform_4, window_bounds = array<i64: 1, 256>}, {transform_indices = @transform_5, window_bounds = array<i64: 32, 256>}, {transform_indices = @transform_6, window_bounds = array<i64: 32, 1>}, {pipeline_mode = #tpu.pipeline_mode<synchronous>, transform_indices = @transform_7, window_bounds = array<i64: 1, 128>}, {pipeline_mode = #tpu.pipeline_mode<synchronous>, transform_indices = @transform_8, window_bounds = array<i64: 1, 128>}, {transform_indices = @transform_9, window_bounds = array<i64: 32, 2>}]} {
    %c0 = arith.constant 0 : index
    %c0_0 = arith.constant 0 : index
    %c0_1 = arith.constant 0 : index
    %0 = vector.load %arg1[%c0, %c0_0, %c0_1] : memref<32x7x128xf32, #tpu.memory_space<vmem>>, vector<32x7x128xf32>
    %cst = arith.constant dense<0.000000e+00> : vector<32x128xf32>
    %1 = vector.multi_reduction <add>, %0, %cst [1] : vector<32x7x128xf32> to vector<32x128xf32>
    %cst_2 = arith.constant dense<0.000000e+00> : vector<32xf32>
    %2 = vector.multi_reduction <add>, %1, %cst_2 [1] : vector<32x128xf32> to vector<32xf32>
    %3 = vector.shape_cast %2 : vector<32xf32> to vector<32x1xf32>
    %cst_3 = arith.constant 1.280000e+02 : f32
    %4 = vector.broadcast %cst_3 : f32 to vector<32x1xf32>
    %5 = arith.divf %3, %4 : vector<32x1xf32>
    %6 = vector.broadcast %5 : vector<32x1xf32> to vector<32x128xf32>
    %7 = arith.subf %1, %6 : vector<32x128xf32>
    %8 = arith.mulf %7, %7 : vector<32x128xf32>
    %cst_4 = arith.constant dense<0.000000e+00> : vector<32xf32>
    %9 = vector.multi_reduction <add>, %8, %cst_4 [1] : vector<32x128xf32> to vector<32xf32>
    %10 = vector.shape_cast %9 : vector<32xf32> to vector<32x1xf32>
    %cst_5 = arith.constant 1.280000e+02 : f32
    %11 = vector.broadcast %cst_5 : f32 to vector<32x1xf32>
    %12 = arith.divf %10, %11 : vector<32x1xf32>
    %13 = vector.broadcast %5 : vector<32x1xf32> to vector<32x128xf32>
    %14 = arith.subf %1, %13 : vector<32x128xf32>
    %cst_6 = arith.constant 9.99999974E-6 : f32
    %15 = vector.broadcast %cst_6 : f32 to vector<32x1xf32>
    %16 = arith.addf %12, %15 : vector<32x1xf32>
    %17 = math.rsqrt %16 : vector<32x1xf32>
    %18 = vector.broadcast %17 : vector<32x1xf32> to vector<32x128xf32>
    %19 = arith.mulf %14, %18 : vector<32x128xf32>
    %c0_7 = arith.constant 0 : index
    %c0_8 = arith.constant 0 : index
    %20 = vector.load %arg8[%c0_7, %c0_8] : memref<1x128xf32, #tpu.memory_space<vmem>>, vector<1x128xf32>
    %21 = vector.broadcast %20 : vector<1x128xf32> to vector<32x128xf32>
    %22 = arith.mulf %19, %21 : vector<32x128xf32>
    %c0_9 = arith.constant 0 : index
    %c0_10 = arith.constant 0 : index
    %23 = vector.load %arg9[%c0_9, %c0_10] : memref<1x128xf32, #tpu.memory_space<vmem>>, vector<1x128xf32>
    %24 = vector.broadcast %23 : vector<1x128xf32> to vector<32x128xf32>
    %25 = arith.addf %22, %24 : vector<32x128xf32>
    %c0_11 = arith.constant 0 : index
    %c0_12 = arith.constant 0 : index
    %26 = vector.load %arg4[%c0_11, %c0_12] : memref<256x128xf32, #tpu.memory_space<vmem>>, vector<256x128xf32>
    %cst_13 = arith.constant dense<0.000000e+00> : vector<32x256xf32>
    %27 = tpu.matmul %25, %26, %cst_13 {dimension_numbers = #tpu.dot_dimension_numbers<[1], [1], [0], [0], [0, 0, 1, 0], [], []>} : vector<32x128xf32>, vector<256x128xf32>, vector<32x256xf32> -> vector<32x256xf32>
    %c0_14 = arith.constant 0 : index
    %c0_15 = arith.constant 0 : index
    %28 = vector.load %arg5[%c0_14, %c0_15] : memref<1x256xf32, #tpu.memory_space<vmem>>, vector<1x256xf32>
    %29 = vector.broadcast %28 : vector<1x256xf32> to vector<32x256xf32>
    %30 = arith.addf %27, %29 : vector<32x256xf32>
    %c0_16 = arith.constant 0 : index
    %c0_17 = arith.constant 0 : index
    %31 = vector.load %arg6[%c0_16, %c0_17] : memref<32x256xf32, #tpu.memory_space<vmem>>, vector<32x256xf32>
    %32 = arith.addf %30, %31 : vector<32x256xf32>
    %cst_18 = arith.constant dense<0xFF800000> : vector<32xf32>
    %33 = vector.multi_reduction <maximumf>, %32, %cst_18 [1] : vector<32x256xf32> to vector<32xf32>
    %34 = vector.shape_cast %33 : vector<32xf32> to vector<32x1xf32>
    %35 = vector.broadcast %34 : vector<32x1xf32> to vector<32x256xf32>
    %36 = arith.subf %32, %35 : vector<32x256xf32>
    %37 = math.exp %36 : vector<32x256xf32>
    %cst_19 = arith.constant dense<0.000000e+00> : vector<32xf32>
    %38 = vector.multi_reduction <add>, %37, %cst_19 [1] : vector<32x256xf32> to vector<32xf32>
    %39 = vector.shape_cast %38 : vector<32xf32> to vector<32x1xf32>
    %40 = math.log %39 : vector<32x1xf32>
    %41 = arith.addf %40, %34 : vector<32x1xf32>
    %42 = tpu.iota {dimensions = array<i32: 1>} : vector<32x256xi32>
    %c0_20 = arith.constant 0 : index
    %c0_21 = arith.constant 0 : index
    %43 = vector.load %arg7[%c0_20, %c0_21] : memref<32x1xi32, #tpu.memory_space<vmem>>, vector<32x1xi32>
    %44 = vector.broadcast %43 : vector<32x1xi32> to vector<32x256xi32>
    %45 = arith.cmpi eq, %42, %44 : vector<32x256xi32>
    %cst_22 = arith.constant 0.000000e+00 : f32
    %46 = vector.broadcast %cst_22 : f32 to vector<32x256xf32>
    %47 = arith.select %45, %30, %46 : vector<32x256xi1>, vector<32x256xf32>
    %cst_23 = arith.constant dense<0.000000e+00> : vector<32xf32>
    %48 = vector.multi_reduction <add>, %47, %cst_23 [1] : vector<32x256xf32> to vector<32xf32>
    %49 = vector.shape_cast %48 : vector<32xf32> to vector<32x1xf32>
    %50 = arith.subf %49, %41 : vector<32x1xf32>
    %c0_24 = arith.constant 0 : index
    %c0_25 = arith.constant 0 : index
    %c0_26 = arith.constant 0 : index
    %51 = vector.load %arg2[%c0_24, %c0_25, %c0_26] : memref<32x6x128xf32, #tpu.memory_space<vmem>>, vector<32x6x128xf32>
    %c0_27 = arith.constant 0 : index
    %c0_28 = arith.constant 0 : index
    %c0_29 = arith.constant 0 : index
    %52 = vector.load %arg3[%c0_27, %c0_28, %c0_29] : memref<32x6x128xf32, #tpu.memory_space<vmem>>, vector<32x6x128xf32>
    %53 = arith.mulf %51, %52 : vector<32x6x128xf32>
    %cst_30 = arith.constant dense<0.000000e+00> : vector<32x6xf32>
    %54 = vector.multi_reduction <add>, %53, %cst_30 [2] : vector<32x6x128xf32> to vector<32x6xf32>
    %55 = arith.mulf %51, %51 : vector<32x6x128xf32>
    %cst_31 = arith.constant dense<0.000000e+00> : vector<32x6xf32>
    %56 = vector.multi_reduction <add>, %55, %cst_31 [2] : vector<32x6x128xf32> to vector<32x6xf32>
    %57 = arith.mulf %52, %52 : vector<32x6x128xf32>
    %cst_32 = arith.constant dense<0.000000e+00> : vector<32x6xf32>
    %58 = vector.multi_reduction <add>, %57, %cst_32 [2] : vector<32x6x128xf32> to vector<32x6xf32>
    %cst_33 = arith.constant 1.000000e-16 : f32
    %59 = vector.broadcast %cst_33 : f32 to vector<32x6xf32>
    %60 = arith.maximumf %56, %59 : vector<32x6xf32>
    %cst_34 = arith.constant 1.000000e-16 : f32
    %61 = vector.broadcast %cst_34 : f32 to vector<32x6xf32>
    %62 = arith.maximumf %58, %61 : vector<32x6xf32>
    %63 = arith.mulf %60, %62 : vector<32x6xf32>
    %64 = math.rsqrt %63 : vector<32x6xf32>
    %65 = arith.mulf %54, %64 : vector<32x6xf32>
    %cst_35 = arith.constant dense<0.000000e+00> : vector<32xf32>
    %66 = vector.multi_reduction <add>, %65, %cst_35 [1] : vector<32x6xf32> to vector<32xf32>
    %67 = vector.shape_cast %66 : vector<32xf32> to vector<32x1xf32>
    %68 = tpu.concatenate %50, %67 in 1 : vector<32x1xf32>, vector<32x1xf32> -> vector<32x2xf32>
    %c0_36 = arith.constant 0 : index
    %c0_37 = arith.constant 0 : index
    %69 = vector.load %arg10[%c0_36, %c0_37] : memref<32x2xf32, #tpu.memory_space<vmem>>, vector<32x2xf32>
    tpu.vector_store %arg10[%c0_36, %c0_37], %68 {strides = array<i32>} : memref<32x2xf32, #tpu.memory_space<vmem>>, vector<32x2xf32>,
    return
  }
  func.func @transform_0(%arg0: i32) -> (i32, i32, i32) {
    %c0_i32 = arith.constant 0 : i32
    %c0_i32_0 = arith.constant 0 : i32
    %c0_i32_1 = arith.constant 0 : i32
    return %arg0, %c0_i32, %c0_i32_0 : i32, i32, i32
  }
  func.func @transform_1(%arg0: i32) -> (i32, i32, i32) {
    %c0_i32 = arith.constant 0 : i32
    %c0_i32_0 = arith.constant 0 : i32
    %c0_i32_1 = arith.constant 0 : i32
    return %arg0, %c0_i32, %c0_i32_0 : i32, i32, i32
  }
  func.func @transform_2(%arg0: i32) -> (i32, i32, i32) {
    %c0_i32 = arith.constant 0 : i32
    %c0_i32_0 = arith.constant 0 : i32
    %c0_i32_1 = arith.constant 0 : i32
    return %arg0, %c0_i32, %c0_i32_0 : i32, i32, i32
  }
  func.func @transform_3(%arg0: i32) -> (i32, i32) {
    %c0_i32 = arith.constant 0 : i32
    %c0_i32_0 = arith.constant 0 : i32
    %c0_i32_1 = arith.constant 0 : i32
    return %c0_i32, %c0_i32_0 : i32, i32
  }
  func.func @transform_4(%arg0: i32) -> (i32, i32) {
    %c0_i32 = arith.constant 0 : i32
    %c0_i32_0 = arith.constant 0 : i32
    %c0_i32_1 = arith.constant 0 : i32
    return %c0_i32, %c0_i32_0 : i32, i32
  }
  func.func @transform_5(%arg0: i32) -> (i32, i32) {
    %c0_i32 = arith.constant 0 : i32
    %c0_i32_0 = arith.constant 0 : i32
    return %arg0, %c0_i32 : i32, i32
  }
  func.func @transform_6(%arg0: i32) -> (i32, i32) {
    %c0_i32 = arith.constant 0 : i32
    %c0_i32_0 = arith.constant 0 : i32
    return %arg0, %c0_i32 : i32, i32
  }
  func.func @transform_7(%arg0: i32) -> (i32, i32) {
    %c0_i32 = arith.constant 0 : i32
    %c0_i32_0 = arith.constant 0 : i32
    %c0_i32_1 = arith.constant 0 : i32
    return %c0_i32, %c0_i32_0 : i32, i32
  }
  func.func @transform_8(%arg0: i32) -> (i32, i32) {
    %c0_i32 = arith.constant 0 : i32
    %c0_i32_0 = arith.constant 0 : i32
    %c0_i32_1 = arith.constant 0 : i32
    return %c0_i32, %c0_i32_0 : i32, i32
  }
  func.func @transform_9(%arg0: i32) -> (i32, i32) {
    %c0_i32 = arith.constant 0 : i32
    %c0_i32_0 = arith.constant 0 : i32
    return %arg0, %c0_i32 : i32, i32
  }
}

</mosaic_0001>

<bundles_post_ra>
// kernel: cbow_model_forward.1
= control target key start
LH: loop header
LB: loop body
LE: loop exit
PB: predicated region body
PF: predicated region fallthrough
CT: control target
= control target key end

     0   :  { %vm64_vm0 = vcmask 1046528   ;;  %vm321_vm1 = vcmask 1041409   ;;  %vm323_vm2 = vcmask 1042434   ;;  %vm325_vm3 = vcmask 1043459   ;;  %s3837_s0 = inlined_call_operand.vmem [shape: f32[32,7,128], index: 0, kind: input, shape index: {}]   ;;  %s3838_s3 = inlined_call_operand.vmem [shape: f32[256,128], index: 3, kind: input, shape index: {}]   ;;  %s3839_s6 = inlined_call_operand.vmem [shape: s32[32,1], index: 6, kind: input, shape index: {}]   ;;  %s3840_s1 = inlined_call_operand.vmem [shape: f32[32,6,128], index: 1, kind: input, shape index: {}]   ;;  %s3841_s2 = inlined_call_operand.vmem [shape: f32[32,6,128], index: 2, kind: input, shape index: {}]   ;;  %s3842_s7 = inlined_call_operand.vmem [shape: f32[1,128], index: 7, kind: input, shape index: {}]   ;;  %s3843_s8 = inlined_call_operand.vmem [shape: f32[1,128], index: 8, kind: input, shape index: {}]   ;;  %s3844_s4 = inlined_call_operand.vmem [shape: f32[1,256], index: 4, kind: input, shape index: {}]   ;;  %s3845_s5 = inlined_call_operand.vmem [shape: f32[32,256], index: 5, kind: input, shape index: {}]   ;;  %s3846_s9 = inlined_call_operand.vmem [shape: f32[32,2], index: 9, kind: output, shape index: {}]  }
   0x1   :  { %v40_v0 = vld [vmem:[%s3837_s0 + $0x40] sm:$0x7f]  ;;  %v41_v1 = vld [vmem:[%s3837_s0 + $0x48] sm:$0x7f]  ;;  %v42_v2 = vld [vmem:[%s3837_s0 + $0x50] sm:$0x7f] }
   0x2   :  { %v43_v3 = vld [vmem:[%s3837_s0 + $0x58] sm:$0x7f]  ;;  %v44_v4 = vld [vmem:[%s3837_s0 + $0x60] sm:$0x7f]  ;;  %v45_v5 = vld [vmem:[%s3837_s0 + $0x68] sm:$0x7f] }
   0x3   :  { %v46_v6 = vld [vmem:[%s3837_s0 + $0x70] sm:$0x7f]  ;;  %v121_v7 = vsel %vm64_vm0, %v40_v0, 0.0  ;;  %v128_v8 = vsel %vm64_vm0, %v41_v1, 0.0  ;;  %v47_v9 = vld [vmem:[%s3837_s0 + $0x78] sm:$0x7f] }
   0x4   :  { %v122_v10 = vrot.slane %v121_v7, 4  ;;  %v129_v11 = vrot.slane %v128_v8, 4  ;;  %v135_v12 = vsel %vm64_vm0, %v42_v2, 0.0  ;;  %v142_v13 = vsel %vm64_vm0, %v43_v3, 0.0  ;;  %v32_v58 = vld [vmem:[%s3837_s0] sm:$0x7f] }
   0x5   :  { %v136_v14 = vrot.slane %v135_v12, 4  ;;  %v143_v15 = vrot.slane %v142_v13, 4  ;;  %v149_v16 = vsel %vm64_vm0, %v44_v4, 0.0  ;;  %v156_v17 = vsel %vm64_vm0, %v45_v5, 0.0  ;;  %v33_v59 = vld [vmem:[%s3837_s0 + $0x8] sm:$0x7f] }
   0x6   :  { %v123_v18 = vadd.f32 %v122_v10, %v121_v7  ;;  %v130_v19 = vadd.f32 %v129_v11, %v128_v8  ;;  %v150_v20 = vrot.slane %v149_v16, 4  ;;  %v157_v21 = vrot.slane %v156_v17, 4  ;;  %v34_v60 = vld [vmem:[%s3837_s0 + $0x10] sm:$0x7f]  ;;  %v35_v1 = vld [vmem:[%s3837_s0 + $0x18] sm:$0x7f] }
   0x7   :  { %v137_v22 = vadd.f32 %v136_v14, %v135_v12  ;;  %v144_v23 = vadd.f32 %v143_v15, %v142_v13  ;;  %v163_v24 = vsel %vm64_vm0, %v46_v6, 0.0  ;;  %v170_v25 = vsel %vm64_vm0, %v47_v9, 0.0  ;;  %v36_v3 = vld [vmem:[%s3837_s0 + $0x20] sm:$0x7f]  ;;  %v37_v12 = vld [vmem:[%s3837_s0 + $0x28] sm:$0x7f] }
   0x8   :  { %v124_v26 = vrot.slane %v123_v18, 2  ;;  %v131_v27 = vrot.slane %v130_v19, 2  ;;  %v151_v28 = vadd.f32 %v150_v20, %v149_v16  ;;  %v158_v29 = vadd.f32 %v157_v21, %v156_v17  ;;  %v38_v21 = vld [vmem:[%s3837_s0 + $0x30] sm:$0x7f] }
   0x9   :  { %v138_v30 = vrot.slane %v137_v22, 2  ;;  %v145_v31 = vrot.slane %v144_v23, 2  ;;  %v164_v32 = vrot.slane %v163_v24, 4  ;;  %v171_v33 = vrot.slane %v170_v25, 4 }
   0xa   :  { %v125_v34 = vadd.f32 %v124_v26, %v123_v18  ;;  %v132_v35 = vadd.f32 %v131_v27, %v130_v19  ;;  %v152_v36 = vrot.slane %v151_v28, 2  ;;  %v159_v37 = vrot.slane %v158_v29, 2 }
   0xb   :  { %v139_v38 = vadd.f32 %v138_v30, %v137_v22  ;;  %v146_v39 = vadd.f32 %v145_v31, %v144_v23  ;;  %v165_v40 = vadd.f32 %v164_v32, %v163_v24  ;;  %v172_v41 = vadd.f32 %v171_v33, %v170_v25  ;;  %v39_v30 = vld [vmem:[%s3837_s0 + $0x38] sm:$0x7f] }
   0xc   :  { %v126_v42 = vrot.slane %v125_v34, 1  ;;  %v133_v43 = vrot.slane %v132_v35, 1  ;;  %v153_v44 = vadd.f32 %v152_v36, %v151_v28  ;;  %v160_v45 = vadd.f32 %v159_v37, %v158_v29 }
   0xd   :  { %v140_v46 = vrot.slane %v139_v38, 1  ;;  %v147_v47 = vrot.slane %v146_v39, 1  ;;  %v166_v48 = vrot.slane %v165_v40, 2  ;;  %v173_v49 = vrot.slane %v172_v41, 2 }
   0xe   :  { %v2245_v50 = vadd.f32 %v126_v42, %v125_v34  ;;  %v2247_v51 = vadd.f32 %v133_v43, %v132_v35  ;;  %v154_v52 = vrot.slane %v153_v44, 1  ;;  %v161_v53 = vrot.slane %v160_v45, 1 }
   0xf   :  { %v2249_v54 = vadd.f32 %v140_v46, %v139_v38  ;;  %v2251_v55 = vadd.f32 %v147_v47, %v146_v39  ;;  %v167_v56 = vadd.f32 %v166_v48, %v165_v40  ;;  %v174_v57 = vadd.f32 %v173_v49, %v172_v41 }
  0x10   :  { %v2262_v61 = vadd.f32 %v154_v52, %v153_v44  ;;  %v2264_v62 = vadd.f32 %v161_v53, %v160_v45  ;;  %vm327_vm4 = vcmask 1044484   ;;  %vm329_vm5 = vcmask 1045509   ;;  %v56_v52 = vld [vmem:[%s3837_s0 + $0xc0] sm:$0x7f] }
  0x11   :  { %v168_v63 = vrot.slane %v167_v56, 1  ;;  %v175_v0 = vrot.slane %v174_v57, 1  ;;  %vm331_vm6 = vcmask 1046534   ;;  %vm333_vm7 = vcmask 1047559  }
  0x12   :  { %v335_v2 = vsel %vm321_vm1, %v2247_v51, %v2245_v50  ;;  %v65_v4 = vsel %vm64_vm0, %v32_v58, 0.0  ;;  %v72_v5 = vsel %vm64_vm0, %v33_v59, 0.0  ;;  %v79_v6 = vsel %vm64_vm0, %v34_v60, 0.0 }
  0x13   :  { %v2278_v7 = vadd.f32 %v168_v63, %v167_v56  ;;  %v2280_v8 = vadd.f32 %v175_v0, %v174_v57  ;;  %v336_v9 = vsel %vm323_vm2, %v2249_v54, %v335_v2  ;;  %v66_v10 = vrot.slane %v65_v4, 4 }
  0x14   :  { %v337_v11 = vsel %vm325_vm3, %v2251_v55, %v336_v9  ;;  %v73_v13 = vrot.slane %v72_v5, 4  ;;  %v80_v14 = vrot.slane %v79_v6, 4  ;;  %v86_v15 = vsel %vm64_vm0, %v35_v1, 0.0  ;;  %v57_v1 = vld [vmem:[%s3837_s0 + $0xc8] sm:$0x7f] }
  0x15   :  { %v338_v16 = vsel %vm327_vm4, %v2262_v61, %v337_v11  ;;  %v67_v17 = vadd.f32 %v66_v10, %v65_v4  ;;  %v87_v18 = vrot.slane %v86_v15, 4  ;;  %v93_v19 = vsel %vm64_vm0, %v36_v3, 0.0  ;;  %v58_v11 = vld [vmem:[%s3837_s0 + $0xd0] sm:$0x7f] }
  0x16   :  { %v339_v20 = vsel %vm329_vm5, %v2264_v62, %v338_v16  ;;  %v74_v22 = vadd.f32 %v73_v13, %v72_v5  ;;  %v81_v23 = vadd.f32 %v80_v14, %v79_v6  ;;  %v94_v24 = vrot.slane %v93_v19, 4 }
  0x17   :  { %v340_v25 = vsel %vm331_vm6, %v2278_v7, %v339_v20  ;;  %v68_v26 = vrot.slane %v67_v17, 2  ;;  %v88_v27 = vadd.f32 %v87_v18, %v86_v15  ;;  %v100_v28 = vsel %vm64_vm0, %v37_v12, 0.0  ;;  %v60_v20 = vld [vmem:[%s3837_s0 + $0xe0] sm:$0x7f] }
  0x18   :  { %v341_v29 = vsel %vm333_vm7, %v2280_v8, %v340_v25  ;;  %v75_v31 = vrot.slane %v74_v22, 2  ;;  %v82_v32 = vrot.slane %v81_v23, 2  ;;  %v95_v33 = vadd.f32 %v94_v24, %v93_v19  ;;  %v59_v19 = vld [vmem:[%s3837_s0 + $0xd8] sm:$0x7f] }
  0x19   :  { %362 = vadd.xlane.f32.xlu1 %v341_v29  ;;  %v69_v34 = vadd.f32 %v68_v26, %v67_v17  ;;  %v89_v35 = vrot.slane %v88_v27, 2  ;;  %v101_v36 = vrot.slane %v100_v28, 4  ;;  %v107_v37 = vsel %vm64_vm0, %v38_v21, 0.0 }
  0x1a   :  { %v76_v38 = vadd.f32 %v75_v31, %v74_v22  ;;  %v83_v39 = vadd.f32 %v82_v32, %v81_v23  ;;  %v96_v40 = vrot.slane %v95_v33, 2  ;;  %v108_v41 = vrot.slane %v107_v37, 4 }
  0x1b   :  { %v70_v42 = vrot.slane %v69_v34, 1  ;;  %v90_v43 = vadd.f32 %v89_v35, %v88_v27  ;;  %v102_v44 = vadd.f32 %v101_v36, %v100_v28  ;;  %v114_v45 = vsel %vm64_vm0, %v39_v30, 0.0  ;;  %v61_v28 = vld [vmem:[%s3837_s0 + $0xe8] sm:$0x7f] }
  0x1c   :  { %v77_v46 = vrot.slane %v76_v38, 1  ;;  %v84_v47 = vrot.slane %v83_v39, 1  ;;  %v97_v48 = vadd.f32 %v96_v40, %v95_v33  ;;  %v109_v49 = vadd.f32 %v108_v41, %v107_v37  ;;  %v62_v37 = vld [vmem:[%s3837_s0 + $0xf0] sm:$0x7f] }
  0x1d   :  { %v2311_v53 = vadd.f32 %v70_v42, %v69_v34  ;;  %v91_v56 = vrot.slane %v90_v43, 1  ;;  %v103_v57 = vrot.slane %v102_v44, 2  ;;  %v115_v58 = vrot.slane %v114_v45, 4 }
  0x1e   :  { %v2313_v59 = vadd.f32 %v77_v46, %v76_v38  ;;  %v2315_v60 = vadd.f32 %v84_v47, %v83_v39  ;;  %v98_v63 = vrot.slane %v97_v48, 1  ;;  %v110_v0 = vrot.slane %v109_v49, 2 }
  0x1f   :  { %v2320_v2 = vadd.f32 %v91_v56, %v90_v43  ;;  %v104_v3 = vadd.f32 %v103_v57, %v102_v44  ;;  %v116_v4 = vadd.f32 %v115_v58, %v114_v45  ;;  %v233_v5 = vsel %vm64_vm0, %v56_v52, 0.0  ;;  %v63_v45 = vld [vmem:[%s3837_s0 + $0xf8] sm:$0x7f] }
  0x20   :  { %v2323_v6 = vadd.f32 %v98_v63, %v97_v48  ;;  %v111_v9 = vadd.f32 %v110_v0, %v109_v49  ;;  %v322_v10 = vsel %vm321_vm1, %v2313_v59, %v2311_v53  ;;  %v234_v12 = vrot.slane %v233_v5, 4 }
  0x21   :  { %v105_v13 = vrot.slane %v104_v3, 1  ;;  %v117_v14 = vrot.slane %v116_v4, 2  ;;  %v324_v15 = vsel %vm323_vm2, %v2315_v60, %v322_v10  ;;  %v240_v16 = vsel %vm64_vm0, %v57_v1, 0.0 }
  0x22   :  { %v112_v17 = vrot.slane %v111_v9, 1  ;;  %v326_v18 = vsel %vm325_vm3, %v2320_v2, %v324_v15  ;;  %v235_v21 = vadd.f32 %v234_v12, %v233_v5  ;;  %v241_v22 = vrot.slane %v240_v16, 4 }
  0x23   :  { %v2342_v23 = vadd.f32 %v105_v13, %v104_v3  ;;  %v118_v24 = vadd.f32 %v117_v14, %v116_v4  ;;  %v328_v25 = vsel %vm327_vm4, %v2323_v6, %v326_v18  ;;  %v247_v26 = vsel %vm64_vm0, %v58_v11, 0.0  ;;  %v48_v4 = vld [vmem:[%s3837_s0 + $0x80] sm:$0x7f] }
  0x24   :  { %v2347_v27 = vadd.f32 %v112_v17, %v111_v9  ;;  %v236_v29 = vrot.slane %v235_v21, 2  ;;  %v242_v30 = vadd.f32 %v241_v22, %v240_v16  ;;  %v248_v31 = vrot.slane %v247_v26, 4 }
  0x25   :  { %v119_v32 = vrot.slane %v118_v24, 1  ;;  %v330_v33 = vsel %vm329_vm5, %v2342_v23, %v328_v25  ;;  %v254_v34 = vsel %vm64_vm0, %v59_v19, 0.0  ;;  %v261_v35 = vsel %vm64_vm0, %v60_v20, 0.0  ;;  %v49_v19 = vld [vmem:[%s3837_s0 + $0x88] sm:$0x7f] }
  0x26   :  { %v332_v36 = vsel %vm331_vm6, %v2347_v27, %v330_v33  ;;  %v237_v38 = vadd.f32 %v236_v29, %v235_v21  ;;  %v243_v39 = vrot.slane %v242_v30, 2  ;;  %v249_v40 = vadd.f32 %v248_v31, %v247_v26 }
  0x27   :  { %v2361_v41 = vadd.f32 %v119_v32, %v118_v24  ;;  %v255_v42 = vrot.slane %v254_v34, 4  ;;  %v262_v43 = vrot.slane %v261_v35, 4  ;;  %v268_v44 = vsel %vm64_vm0, %v61_v28, 0.0 }
  0x28   :  { %v238_v46 = vrot.slane %v237_v38, 1  ;;  %v244_v47 = vadd.f32 %v243_v39, %v242_v30  ;;  %v250_v48 = vrot.slane %v249_v40, 2  ;;  %v269_v49 = vrot.slane %v268_v44, 4  ;;  %v50_v30 = vld [vmem:[%s3837_s0 + $0x90] sm:$0x7f] }
  0x29   :  { %v334_v52 = vsel %vm333_vm7, %v2361_v41, %v332_v36  ;;  %v256_v56 = vadd.f32 %v255_v42, %v254_v34  ;;  %v263_v57 = vadd.f32 %v262_v43, %v261_v35  ;;  %v275_v58 = vsel %vm64_vm0, %v62_v37, 0.0  ;;  %v51_v39 = vld [vmem:[%s3837_s0 + $0x98] sm:$0x7f] }
  0x2a   :  { %360 = vadd.xlane.f32.xlu0 %v334_v52  ;;  %v2370_v63 = vadd.f32 %v238_v46, %v237_v38  ;;  %v245_v0 = vrot.slane %v244_v47, 1  ;;  %v251_v1 = vadd.f32 %v250_v48, %v249_v40  ;;  %v270_v3 = vadd.f32 %v269_v49, %v268_v44  ;;  %v52_v48 = vld [vmem:[%s3837_s0 + $0xa0] sm:$0x7f] }
  0x2b   :  { %v257_v5 = vrot.slane %v256_v56, 2  ;;  %v264_v9 = vrot.slane %v263_v57, 2  ;;  %v276_v10 = vrot.slane %v275_v58, 4  ;;  %v282_v11 = vsel %vm64_vm0, %v63_v45, 0.0 }
  0x2c   :  { %v2376_v12 = vadd.f32 %v245_v0, %v244_v47  ;;  %v252_v13 = vrot.slane %v251_v1, 1  ;;  %v271_v14 = vrot.slane %v270_v3, 2  ;;  %v283_v15 = vrot.slane %v282_v11, 4 }
  0x2d   :  { %v258_v16 = vadd.f32 %v257_v5, %v256_v56  ;;  %v265_v17 = vadd.f32 %v264_v9, %v263_v57  ;;  %v277_v18 = vadd.f32 %v276_v10, %v275_v58  ;;  %v177_v20 = vsel %vm64_vm0, %v48_v4, 0.0  ;;  %v53_v4 = vld [vmem:[%s3837_s0 + $0xa8] sm:$0x7f] }
  0x2e   :  { %v2382_v21 = vadd.f32 %v252_v13, %v251_v1  ;;  %v272_v22 = vadd.f32 %v271_v14, %v270_v3  ;;  %v284_v24 = vadd.f32 %v283_v15, %v282_v11  ;;  %v349_v25 = vsel %vm321_vm1, %v2376_v12, %v2370_v63  ;;  %v54_v11 = vld [vmem:[%s3837_s0 + $0xb0] sm:$0x7f] }
  0x2f   :  { %v259_v26 = vrot.slane %v258_v16, 1  ;;  %v266_v28 = vrot.slane %v265_v17, 1  ;;  %v278_v29 = vrot.slane %v277_v18, 2  ;;  %v178_v31 = vrot.slane %v177_v20, 4 }
  0x30   :  { %v273_v32 = vrot.slane %v272_v22, 1  ;;  %v285_v33 = vrot.slane %v284_v24, 2  ;;  %v350_v34 = vsel %vm323_vm2, %v2382_v21, %v349_v25  ;;  %v184_v35 = vsel %vm64_vm0, %v49_v19, 0.0 }
  0x31   :  { %v2393_v36 = vadd.f32 %v259_v26, %v258_v16  ;;  %v2395_v37 = vadd.f32 %v266_v28, %v265_v17  ;;  %v279_v38 = vadd.f32 %v278_v29, %v277_v18  ;;  %v179_v40 = vadd.f32 %v178_v31, %v177_v20  ;;  %v55_v17 = vld [vmem:[%s3837_s0 + $0xb8] sm:$0x7f] }
  0x32   :  { %v2400_v42 = vadd.f32 %v273_v32, %v272_v22  ;;  %v286_v43 = vadd.f32 %v285_v33, %v284_v24  ;;  %v185_v44 = vrot.slane %v184_v35, 4  ;;  %v191_v45 = vsel %vm64_vm0, %v50_v30, 0.0 }
  0x33   :  { %v280_v46 = vrot.slane %v279_v38, 1  ;;  %v351_v47 = vsel %vm325_vm3, %v2393_v36, %v350_v34  ;;  %v180_v49 = vrot.slane %v179_v40, 2  ;;  %v192_v52 = vrot.slane %v191_v45, 4 }
  0x34   :  { %v287_v56 = vrot.slane %v286_v43, 1  ;;  %v352_v57 = vsel %vm327_vm4, %v2395_v37, %v351_v47  ;;  %v186_v58 = vadd.f32 %v185_v44, %v184_v35  ;;  %v198_v0 = vsel %vm64_vm0, %v51_v39, 0.0 }
  0x35   :  { %v2411_v1 = vadd.f32 %v280_v46, %v279_v38  ;;  %v353_v3 = vsel %vm329_vm5, %v2400_v42, %v352_v57  ;;  %v181_v5 = vadd.f32 %v180_v49, %v179_v40  ;;  %v193_v9 = vadd.f32 %v192_v52, %v191_v45 }
  0x36   :  { %v2418_v10 = vadd.f32 %v287_v56, %v286_v43  ;;  %v187_v13 = vrot.slane %v186_v58, 2  ;;  %v199_v14 = vrot.slane %v198_v0, 4  ;;  %v205_v15 = vsel %vm64_vm0, %v52_v48, 0.0 }
  0x37   :  { %v354_v16 = vsel %vm331_vm6, %v2411_v1, %v353_v3  ;;  %v182_v18 = vrot.slane %v181_v5, 1  ;;  %v194_v19 = vrot.slane %v193_v9, 2  ;;  %v206_v20 = vrot.slane %v205_v15, 4 }
  0x38   :  { %v355_v22 = vsel %vm333_vm7, %v2418_v10, %v354_v16  ;;  %v188_v24 = vadd.f32 %v187_v13, %v186_v58  ;;  %v200_v25 = vadd.f32 %v199_v14, %v198_v0  ;;  %v212_v26 = vsel %vm64_vm0, %v53_v4, 0.0 }
  0x39   :  { %366 = vadd.xlane.f32.xlu1 %v355_v22  ;;  %v2432_v28 = vadd.f32 %v182_v18, %v181_v5  ;;  %v195_v29 = vadd.f32 %v194_v19, %v193_v9  ;;  %v207_v30 = vadd.f32 %v206_v20, %v205_v15  ;;  %v213_v31 = vrot.slane %v212_v26, 4 }
  0x3a   :  { %v189_v32 = vrot.slane %v188_v24, 1  ;;  %v201_v33 = vrot.slane %v200_v25, 2  ;;  %v219_v34 = vsel %vm64_vm0, %v54_v11, 0.0  ;;  %v226_v35 = vsel %vm64_vm0, %v55_v17, 0.0 }
  0x3b   :  { %v196_v38 = vrot.slane %v195_v29, 1  ;;  %v208_v39 = vrot.slane %v207_v30, 2  ;;  %v214_v40 = vadd.f32 %v213_v31, %v212_v26  ;;  %v220_v43 = vrot.slane %v219_v34, 4 }
  0x3c   :  { %v2436_v44 = vadd.f32 %v189_v32, %v188_v24  ;;  %v202_v45 = vadd.f32 %v201_v33, %v200_v25  ;;  %v227_v46 = vrot.slane %v226_v35, 4  ;;  %v2162_v31 = vmov 0  }
  0x3d   :  { %v2438_v47 = vadd.f32 %v196_v38, %v195_v29  ;;  %v209_v48 = vadd.f32 %v208_v39, %v207_v30  ;;  %v215_v49 = vrot.slane %v214_v40, 2  ;;  %v221_v52 = vadd.f32 %v220_v43, %v219_v34  ;;  %2043 = vset.pattern.permute.xlu1 %v2162_v31  ;;  %2042 = vset.pattern.permute.xlu0 %v2162_v31 }
  0x3e   :  { %v203_v56 = vrot.slane %v202_v45, 1  ;;  %v228_v57 = vadd.f32 %v227_v46, %v226_v35  ;;  %v342_v58 = vsel %vm321_vm1, %v2436_v44, %v2432_v28  ;;  %vm1235_vm8 = vcmask 1045504  }
  0x3f   :  { %v210_v0 = vrot.slane %v209_v48, 1  ;;  %v216_v3 = vadd.f32 %v215_v49, %v214_v40  ;;  %v222_v4 = vrot.slane %v221_v52, 2  ;;  %v343_v5 = vsel %vm323_vm2, %v2438_v47, %v342_v58 }
  0x40   :  { %v2445_v9 = vadd.f32 %v203_v56, %v202_v45  ;;  %v229_v11 = vrot.slane %v228_v57, 2 }
  0x41   :  { %v2447_v13 = vadd.f32 %v210_v0, %v209_v48  ;;  %v217_v14 = vrot.slane %v216_v3, 1  ;;  %v223_v15 = vadd.f32 %v222_v4, %v221_v52 }
  0x42   :  { %v230_v16 = vadd.f32 %v229_v11, %v228_v57  ;;  %v344_v17 = vsel %vm325_vm3, %v2445_v9, %v343_v5 }
  0x43   :  { %v2451_v18 = vadd.f32 %v217_v14, %v216_v3  ;;  %v224_v19 = vrot.slane %v223_v15, 1  ;;  %v345_v20 = vsel %vm327_vm4, %v2447_v13, %v344_v17 }
  0x44   :  { %v231_v22 = vrot.slane %v230_v16, 1 }
  0x45   :  { %v2455_v24 = vadd.f32 %v224_v19, %v223_v15  ;;  %v346_v25 = vsel %vm329_vm5, %v2451_v18, %v345_v20 }
  0x46   :  { %v2459_v26 = vadd.f32 %v231_v22, %v230_v16 }
  0x47   :  { %v347_v29 = vsel %vm331_vm6, %v2455_v24, %v346_v25 }
  0x48   :  { %v348_v30 = vsel %vm333_vm7, %v2459_v26, %v347_v29 }
  0x49   :  { %364 = vadd.xlane.f32.xlu0 %v348_v30 }
  0xa2   :  { %v363_v32 = vpop.xlane.xlu1 %362 }
  0xa3   :  { %v370_v33 = vmul.f32 0.0078125, %v363_v32 }
  0xa5   :  { %v384_v34 = vrot.slane %v370_v33, 1  ;;  %v385_v35 = vrot.slane %v370_v33, 2  ;;  %v386_v39 = vrot.slane %v370_v33, 3  ;;  %v2472_v43 = vsub.f32 %v2245_v50, %v370_v33 }
  0xa6   :  { %v387_v46 = vrot.slane %v370_v33, 4  ;;  %v388_v56 = vrot.slane %v370_v33, 5  ;;  %v389_v3 = vrot.slane %v370_v33, 6  ;;  %v390_v4 = vrot.slane %v370_v33, 7 }
  0xa7   :  { %v2466_v38 = vsub.f32 %v2247_v51, %v384_v34  ;;  %v2469_v40 = vsub.f32 %v2249_v54, %v385_v35  ;;  %v2477_v48 = vsub.f32 %v2251_v55, %v386_v39  ;;  %v477_v51 = vmul.f32 %v2472_v43, %v2472_v43 }
  0xa8   :  { %v2484_v54 = vsub.f32 %v2262_v61, %v387_v46  ;;  %v2490_v5 = vsub.f32 %v2264_v62, %v388_v56 }
  0xa9   :  { %v478_v45 = vmul.f32 %v2466_v38, %v2466_v38  ;;  %v479_v49 = vmul.f32 %v2469_v40, %v2469_v40  ;;  %v480_v50 = vmul.f32 %v2477_v48, %v2477_v48 }
  0xaa   :  { %v481_v11 = vmul.f32 %v2484_v54, %v2484_v54 }
  0xab   :  { %v547_v52 = vrot.slane %v478_v45, 7  ;;  %v549_v57 = vrot.slane %v479_v49, 6  ;;  %v551_v61 = vrot.slane %v480_v50, 5 }
  0xac   :  { %v553_v35 = vrot.slane %v481_v11, 4 }
  0xad   :  { %v548_v58 = vsel %vm321_vm1, %v547_v52, %v477_v51  ;;  %v2540_v51 = vsub.f32 %v2280_v8, %v390_v4 }
  0xae   :  { %v550_v14 = vsel %vm323_vm2, %v549_v57, %v548_v58 }
  0xb3   :  { %v361_v0 = vpop.xlane.xlu0 %360 }
  0xb4   :  { %v369_v55 = vmul.f32 0.0078125, %v361_v0 }
  0xb6   :  { %v377_v15 = vrot.slane %v369_v55, 1  ;;  %v378_v16 = vrot.slane %v369_v55, 2  ;;  %v379_v17 = vrot.slane %v369_v55, 3  ;;  %v380_v19 = vrot.slane %v369_v55, 4 }
  0xb7   :  { %v381_v20 = vrot.slane %v369_v55, 5  ;;  %v382_v22 = vrot.slane %v369_v55, 6  ;;  %v383_v25 = vrot.slane %v369_v55, 7  ;;  %v2496_v29 = vsub.f32 %v2311_v53, %v369_v55 }
  0xb8   :  { %v2499_v30 = vsub.f32 %v2313_v59, %v377_v15  ;;  %v2502_v62 = vsub.f32 %v2315_v60, %v378_v16  ;;  %v2505_v31 = vsub.f32 %v2320_v2, %v379_v17  ;;  %v2508_v32 = vsub.f32 %v2323_v6, %v380_v19 }
  0xb9   :  { %v2511_v33 = vsub.f32 %v2342_v23, %v381_v20  ;;  %v2514_v34 = vsub.f32 %v2347_v27, %v382_v22  ;;  %v2517_v53 = vsub.f32 %v2278_v7, %v389_v3  ;;  %v482_v59 = vmul.f32 %v2490_v5, %v2490_v5 }
  0xba   :  { %v2522_v60 = vsub.f32 %v2361_v41, %v383_v25  ;;  %v470_v2 = vmul.f32 %v2499_v30, %v2499_v30  ;;  %v471_v6 = vmul.f32 %v2502_v62, %v2502_v62  ;;  %v472_v23 = vmul.f32 %v2505_v31, %v2505_v31 }
  0xbb   :  { %v473_v27 = vmul.f32 %v2508_v32, %v2508_v32  ;;  %v552_v7 = vsel %vm325_vm3, %v551_v61, %v550_v14  ;;  %v469_v39 = vmul.f32 %v2496_v29, %v2496_v29  ;;  %v474_v41 = vmul.f32 %v2511_v33, %v2511_v33 }
  0xbc   :  { %v533_v45 = vrot.slane %v470_v2, 7  ;;  %v535_v46 = vrot.slane %v471_v6, 6  ;;  %v475_v49 = vmul.f32 %v2514_v34, %v2514_v34  ;;  %v483_v52 = vmul.f32 %v2517_v53, %v2517_v53 }
  0xbd   :  { %v476_v56 = vmul.f32 %v2522_v60, %v2522_v60  ;;  %v537_v57 = vrot.slane %v472_v23, 5  ;;  %v555_v58 = vrot.slane %v482_v59, 3  ;;  %v539_v55 = vrot.slane %v473_v27, 4 }
  0xbe   :  { %v534_v50 = vsel %vm321_vm1, %v533_v45, %v469_v39  ;;  %v554_v3 = vsel %vm327_vm4, %v553_v35, %v552_v7  ;;  %v541_v14 = vrot.slane %v474_v41, 3  ;;  %v543_v4 = vrot.slane %v475_v49, 2 }
  0xbf   :  { %v536_v0 = vsel %vm323_vm2, %v535_v46, %v534_v50  ;;  %v557_v61 = vrot.slane %v483_v52, 2  ;;  %v545_v17 = vrot.slane %v476_v56, 1  ;;  %v484_v19 = vmul.f32 %v2540_v51, %v2540_v51  ;;  %v802_v50 = vld [vmem:[%s3838_s3 + $0x78] sm:$0xff] }
  0xc0   :  { %v538_v11 = vsel %vm325_vm3, %v537_v57, %v536_v0  ;;  %v556_v20 = vsel %vm329_vm5, %v555_v58, %v554_v3  ;;  %v817_v3 = vld [vmem:[%s3838_s3 + $0xf0] sm:$0xff] }
  0xc1   :  { %v540_v8 = vsel %vm327_vm4, %v539_v55, %v538_v11  ;;  %v558_v2 = vsel %vm331_vm6, %v557_v61, %v556_v20  ;;  %v559_v27 = vrot.slane %v484_v19, 1  ;;  %v801_v11 = vld [vmem:[%s3838_s3 + $0x70] sm:$0xff] }
  0xc2   :  { %v367_v15 = vpop.xlane.xlu1 %366  ;;  %v542_v16 = vsel %vm329_vm5, %v541_v14, %v540_v8 }
  0xc3   :  { %v2555_v22 = vmul.f32 0.0078125, %v367_v15  ;;  %v544_v25 = vsel %vm331_vm6, %v543_v4, %v542_v16  ;;  %v560_v35 = vsel %vm333_vm7, %v559_v27, %v558_v2  ;;  %v816_v2 = vld [vmem:[%s3838_s3 + $0xe8] sm:$0xff] }
  0xc4   :  { %v546_v59 = vsel %vm333_vm7, %v545_v17, %v544_v25 }
  0xc5   :  { %593 = vadd.xlane.f32.xlu0 %v546_v59  ;;  %v398_v6 = vrot.slane %v2555_v22, 1  ;;  %v399_v23 = vrot.slane %v2555_v22, 2  ;;  %v400_v39 = vrot.slane %v2555_v22, 3  ;;  %v2572_v45 = vsub.f32 %v2370_v63, %v2555_v22  ;;  %v818_v63 = vld [vmem:[%s3838_s3 + $0xf8] sm:$0xff] }
  0xc6   :  { %v401_v49 = vrot.slane %v2555_v22, 4  ;;  %1969 = vmatprep.subr.mxu0 %v818_v63  ;;  %2009 = vmatprep.subr.mxu1 %v818_v63  ;;  %v403_v8 = vrot.slane %v2555_v22, 6  ;;  %v404_v4 = vrot.slane %v2555_v22, 7 }
  0xc7   :  { %v2563_v7 = vsub.f32 %v2376_v12, %v398_v6  ;;  %v2568_v41 = vsub.f32 %v2382_v21, %v399_v23  ;;  %v2578_v12 = vsub.f32 %v2393_v36, %v400_v39  ;;  %v493_v21 = vmul.f32 %v2572_v45, %v2572_v45  ;;  %1970 = vmatpush3.xpose.msra.mxu0 %v802_v50 }
  0xc8   :  { %v402_v36 = vrot.slane %v2555_v22, 5  ;;  %v2592_v57 = vsub.f32 %v2395_v37, %v401_v49  ;;  %2025 = vmatpush3.xpose.msra.mxu1 %v802_v50  ;;  %1971 = vmatprep.subr.mxu0 %v817_v3 }
  0xc9   :  { %595 = vadd.xlane.f32.xlu0 %v560_v35  ;;  %v494_v46 = vmul.f32 %v2563_v7, %v2563_v7  ;;  %v495_v52 = vmul.f32 %v2568_v41, %v2568_v41  ;;  %v496_v58 = vmul.f32 %v2578_v12, %v2578_v12  ;;  %2010 = vmatprep.subr.mxu1 %v817_v3 }
  0xca   :  { %v2606_v61 = vsub.f32 %v2400_v42, %v402_v36  ;;  %v497_v15 = vmul.f32 %v2592_v57, %v2592_v57  ;;  %v800_v42 = vld [vmem:[%s3838_s3 + $0x68] sm:$0xff]  ;;  %v2668_v3 = vsub.f32 %v2418_v10, %v404_v4  ;;  %v814_v10 = vld [vmem:[%s3838_s3 + $0xd8] sm:$0xff] }
  0xcb   :  { %v575_v56 = vrot.slane %v494_v46, 7  ;;  %v577_v0 = vrot.slane %v495_v52, 6  ;;  %v579_v17 = vrot.slane %v496_v58, 5  ;;  %1972 = vmatpush3.xpose.msra.mxu0 %v801_v11  ;;  %v798_v4 = vld [vmem:[%s3838_s3 + $0x58] sm:$0xff] }
  0xcc   :  { %3861 = vst [vmem:[#allocation2_spill] sm:$0xff] %v2606_v61  ;;  %2026 = vmatpush3.xpose.msra.mxu1 %v801_v11  ;;  %1973 = vmatprep.subr.mxu0 %v816_v2  ;;  %v581_v63 = vrot.slane %v497_v15, 4  ;;  %3863 = vst [vmem:[#allocation4_spill] sm:$0xff] %v2668_v3 }
  0xcd   :  { %v576_v55 = vsel %vm321_vm1, %v575_v56, %v493_v21  ;;  %2011 = vmatprep.subr.mxu1 %v816_v2  ;;  %v2639_v21 = vsub.f32 %v2411_v1, %v403_v8  ;;  %v815_v1 = vld [vmem:[%s3838_s3 + $0xe0] sm:$0xff] }
  0xce   :  { %v578_v16 = vsel %vm323_vm2, %v577_v0, %v576_v55 }
  0xcf   :  { %3862 = vst [vmem:[#allocation3_spill] sm:$0xff] %v2639_v21  ;;  %1974 = vmatpush3.xpose.msra.mxu0 %v800_v42  ;;  %v580_v56 = vsel %vm325_vm3, %v579_v17, %v578_v16  ;;  %v499_v11 = vmul.f32 %v2639_v21, %v2639_v21 }
  0xd0   :  { %2027 = vmatpush3.xpose.msra.mxu1 %v800_v42  ;;  %1975 = vmatprep.subr.mxu0 %v815_v1 }
  0xd1   :  { %2012 = vmatprep.subr.mxu1 %v815_v1 }
  0xd2   :  { %v365_v14 = vpop.xlane.xlu0 %364 }
  0xd3   :  { %v371_v37 = vmul.f32 0.0078125, %v365_v14  ;;  %v1091_v14 = vld [vmem:[%s3839_s6] sm:$0xff] }
  0xd5   :  { %v391_v19 = vrot.slane %v371_v37, 1  ;;  %v392_v20 = vrot.slane %v371_v37, 2  ;;  %v393_v25 = vrot.slane %v371_v37, 3  ;;  %v394_v59 = vrot.slane %v371_v37, 4 }
  0xd6   :  { %v395_v22 = vrot.slane %v371_v37, 5  ;;  %v396_v6 = vrot.slane %v371_v37, 6  ;;  %v397_v23 = vrot.slane %v371_v37, 7  ;;  %v2618_v27 = vsub.f32 %v2432_v28, %v371_v37 }
  0xd7   :  { %v2621_v35 = vsub.f32 %v2436_v44, %v391_v19  ;;  %v2624_v39 = vsub.f32 %v2438_v47, %v392_v20  ;;  %v2627_v46 = vsub.f32 %v2445_v9, %v393_v25  ;;  %v2630_v49 = vsub.f32 %v2447_v13, %v394_v59 }
  0xd8   :  { %v2633_v52 = vsub.f32 %v2451_v18, %v395_v22  ;;  %v2636_v28 = vsub.f32 %v2455_v24, %v396_v6  ;;  %v498_v44 = vmul.f32 %v2606_v61, %v2606_v61  ;;  %v2644_v47 = vsub.f32 %v2459_v26, %v397_v23  ;;  %v799_v24 = vld [vmem:[%s3838_s3 + $0x60] sm:$0xff] }
  0xd9   :  { %v486_v9 = vmul.f32 %v2621_v35, %v2621_v35  ;;  %v487_v13 = vmul.f32 %v2624_v39, %v2624_v39  ;;  %v488_v18 = vmul.f32 %v2627_v46, %v2627_v46  ;;  %v489_v26 = vmul.f32 %v2630_v49, %v2630_v49  ;;  %1976 = vmatpush3.xpose.msra.mxu0 %v799_v24 }
  0xda   :  { %v485_v50 = vmul.f32 %v2618_v27, %v2618_v27  ;;  %v490_v36 = vmul.f32 %v2633_v52, %v2633_v52  ;;  %v491_v55 = vmul.f32 %v2636_v28, %v2636_v28  ;;  %v492_v37 = vmul.f32 %v2644_v47, %v2644_v47  ;;  %2028 = vmatpush3.xpose.msra.mxu1 %v799_v24 }
  0xdb   :  { %v561_v58 = vrot.slane %v486_v9, 7  ;;  %v563_v0 = vrot.slane %v487_v13, 6  ;;  %v565_v15 = vrot.slane %v488_v18, 5  ;;  %v583_v16 = vrot.slane %v498_v44, 3  ;;  %1977 = vmatprep.subr.mxu0 %v814_v10  ;;  %2013 = vmatprep.subr.mxu1 %v814_v10  ;;  %v813_v13 = vld [vmem:[%s3838_s3 + $0xd0] sm:$0xff]  ;;  %v808_v10 = vld [vmem:[%s3838_s3 + $0xa8] sm:$0xff] }
  0xdc   :  { %v567_v19 = vrot.slane %v489_v26, 4  ;;  %v582_v20 = vsel %vm327_vm4, %v581_v63, %v580_v56  ;;  %v569_v59 = vrot.slane %v490_v36, 3  ;;  %v571_v42 = vrot.slane %v491_v55, 2  ;;  %v797_v18 = vld [vmem:[%s3838_s3 + $0x50] sm:$0xff]  ;;  %v812_v63 = vld [vmem:[%s3838_s3 + $0xc8] sm:$0xff]  ;;  %v810_v55 = vld [vmem:[%s3838_s3 + $0xb8] sm:$0xff] }
  0xdd   :  { %v562_v8 = vsel %vm321_vm1, %v561_v58, %v485_v50  ;;  %v585_v22 = vrot.slane %v499_v11, 2  ;;  %1978 = vmatpush3.xpose.msra.mxu0 %v798_v4  ;;  %v573_v23 = vrot.slane %v492_v37, 1  ;;  %v500_v44 = vmul.f32 %v2668_v3, %v2668_v3  ;;  %v796_v50 = vld [vmem:[%s3838_s3 + $0x48] sm:$0xff]  ;;  %v811_v58 = vld [vmem:[%s3838_s3 + $0xc0] sm:$0xff]  ;;  %v794_v11 = vld [vmem:[%s3838_s3 + $0x38] sm:$0xff] }
  0xde   :  { %v564_v17 = vsel %vm323_vm2, %v563_v0, %v562_v8  ;;  %v584_v9 = vsel %vm329_vm5, %v583_v16, %v582_v20  ;;  %2029 = vmatpush3.xpose.msra.mxu1 %v798_v4  ;;  %1979 = vmatprep.subr.mxu0 %v813_v13  ;;  %v795_v0 = vld [vmem:[%s3838_s3 + $0x40] sm:$0xff]  ;;  %v793_v37 = vld [vmem:[%s3838_s3 + $0x30] sm:$0xff]  ;;  %v1092_v16 = vld [vmem:[%s3839_s6 + $0x8] sm:$0xff] }
  0xdf   :  { %v566_v25 = vsel %vm325_vm3, %v565_v15, %v564_v17  ;;  %1096 = vperm.xlu0 %2042, %v1091_v14   ;;  %2014 = vmatprep.subr.mxu1 %v813_v13  ;;  %v586_v26 = vsel %vm331_vm6, %v585_v22, %v584_v9  ;;  %v587_v56 = vrot.slane %v500_v44, 1  ;;  %v809_v14 = vld [vmem:[%s3838_s3 + $0xb0] sm:$0xff]  ;;  %v792_v4 = vld [vmem:[%s3838_s3 + $0x28] sm:$0xff]  ;;  %v2755_v20 = vld [vmem:[%s3841_s2 + $0x20] sm:$0x3f] }
  0xe0   :  { %v568_v2 = vsel %vm327_vm4, %v567_v19, %v566_v25  ;;  %v2729_v8 = vld [vmem:[%s3840_s1 + $0x10] sm:$0x3f]  ;;  %v2750_v19 = vld [vmem:[%s3840_s1 + $0x20] sm:$0x3f]  ;;  %v806_v44 = vld [vmem:[%s3838_s3 + $0x98] sm:$0xff] }
  0xe1   :  { %v570_v6 = vsel %vm329_vm5, %v569_v59, %v568_v2  ;;  %1980 = vmatpush3.xpose.msra.mxu0 %v797_v18  ;;  %v588_v36 = vsel %vm333_vm7, %v587_v56, %v586_v26  ;;  %v2734_v15 = vld [vmem:[%s3841_s2 + $0x10] sm:$0x3f]  ;;  %v807_v25 = vld [vmem:[%s3838_s3 + $0xa0] sm:$0xff]  ;;  %v1207_v22 = vmul.f32 %v2755_v20, %v2750_v19  ;;  %v790_v9 = vld [vmem:[%s3838_s3 + $0x18] sm:$0xff] }
  0xe2   :  { %v572_v1 = vsel %vm331_vm6, %v571_v42, %v570_v6  ;;  %2030 = vmatpush3.xpose.msra.mxu1 %v797_v18  ;;  %1981 = vmatprep.subr.mxu0 %v812_v63  ;;  %v1205_v17 = vmul.f32 %v2734_v15, %v2729_v8  ;;  %v791_v59 = vld [vmem:[%s3838_s3 + $0x20] sm:$0xff]  ;;  %v1093_v2 = vld [vmem:[%s3839_s6 + $0x10] sm:$0xff]  ;;  %v1094_v13 = vld [vmem:[%s3839_s6 + $0x18] sm:$0xff] }
  0xe3   :  { %v574_v24 = vsel %vm333_vm7, %v573_v23, %v572_v1  ;;  %2015 = vmatprep.subr.mxu1 %v812_v63  ;;  %v1145_v6 = vld [vmem:[%s3840_s1 + $0x30] sm:$0x3f]  ;;  %v1248_v18 = vsel %vm1235_vm8, %v1207_v22, 0.0  ;;  %v2793_v26 = vld [vmem:[%s3841_s2 + $0x40] sm:$0x3f] }
  0xe4   :  { %597 = vadd.xlane.f32.xlu1 %v574_v24  ;;  %v1242_v42 = vsel %vm1235_vm8, %v1205_v17, 0.0  ;;  %v1177_v23 = vld [vmem:[%s3841_s2 + $0x30] sm:$0x3f]  ;;  %v2788_v24 = vld [vmem:[%s3840_s1 + $0x40] sm:$0x3f] }
  0xe5   :  { %1982 = vmatpush3.xpose.msra.mxu0 %v796_v50  ;;  %v1209_v1 = vmul.f32 %v1177_v23, %v1145_v6  ;;  %v805_v56 = vld [vmem:[%s3838_s3 + $0x90] sm:$0xff]  ;;  %v787_v17 = vld [vmem:[%s3838_s3] sm:$0xff]  ;;  %v1140_v23 = vld [vmem:[%s3840_s1 + $0x8] sm:$0x3f] }
  0xe6   :  { %2031 = vmatpush3.xpose.msra.mxu1 %v796_v50  ;;  %1983 = vmatprep.subr.mxu0 %v811_v58  ;;  %v789_v63 = vld [vmem:[%s3838_s3 + $0x10] sm:$0xff]  ;;  %v3126_v3 = vld [vmem:[%s3843_s8] ss:$0 sm:$0xff] }
  0xe7   :  { %2016 = vmatprep.subr.mxu1 %v811_v58  ;;  %v1254_v50 = vsel %vm1235_vm8, %v1209_v1, 0.0  ;;  %v2807_v58 = vld [vmem:[%s3840_s1 + $0x50] sm:$0x3f] }
  0xe8   :  { %599 = vadd.xlane.f32.xlu1 %v588_v36  ;;  %v1211_v36 = vmul.f32 %v2793_v26, %v2788_v24 }
  0xe9   :  { %1984 = vmatpush3.xpose.msra.mxu0 %v795_v0 }
  0xea   :  { %2032 = vmatpush3.xpose.msra.mxu1 %v795_v0  ;;  %1985 = vmatprep.subr.mxu0 %v810_v55  ;;  %v2812_v0 = vld [vmem:[%s3841_s2 + $0x50] sm:$0x3f] }
  0xeb   :  { %2017 = vmatprep.subr.mxu1 %v810_v55  ;;  %v804_v55 = vld [vmem:[%s3838_s3 + $0x88] sm:$0xff] }
  0xed   :  { %1986 = vmatpush3.xpose.msra.mxu0 %v794_v11 }
  0xee   :  { %2033 = vmatpush3.xpose.msra.mxu1 %v794_v11  ;;  %1987 = vmatprep.subr.mxu0 %v809_v14  ;;  %v788_v11 = vld [vmem:[%s3838_s3 + $0x8] sm:$0xff] }
  0xef   :  { %2018 = vmatprep.subr.mxu1 %v809_v14  ;;  %v1260_v14 = vsel %vm1235_vm8, %v1211_v36, 0.0 }
  0xf1   :  { %1988 = vmatpush3.xpose.msra.mxu0 %v793_v37 }
  0xf2   :  { %2034 = vmatpush3.xpose.msra.mxu1 %v793_v37  ;;  %1989 = vmatprep.subr.mxu0 %v808_v10  ;;  %v1213_v37 = vmul.f32 %v2812_v0, %v2807_v58 }
  0xf3   :  { %2019 = vmatprep.subr.mxu1 %v808_v10  ;;  %v2831_v10 = vld [vmem:[%s3841_s2 + $0x60] sm:$0x3f] }
  0xf5   :  { %1990 = vmatpush3.xpose.msra.mxu0 %v792_v4 }
  0xf6   :  { %2035 = vmatpush3.xpose.msra.mxu1 %v792_v4  ;;  %1991 = vmatprep.subr.mxu0 %v807_v25  ;;  %v803_v4 = vld [vmem:[%s3838_s3 + $0x80] sm:$0xff] }
  0xf7   :  { %2020 = vmatprep.subr.mxu1 %v807_v25  ;;  %v1266_v25 = vsel %vm1235_vm8, %v1213_v37, 0.0  ;;  %v1172_v37 = vld [vmem:[%s3841_s2 + $0x8] sm:$0x3f] }
  0xf9   :  { %1099 = vperm.xlu1 %2043, %v1092_v16   ;;  %1992 = vmatpush3.xpose.msra.mxu0 %v791_v59  ;;  %v2826_v16 = vld [vmem:[%s3840_s1 + $0x60] sm:$0x3f] }
  0xfa   :  { %2036 = vmatpush3.xpose.msra.mxu1 %v791_v59  ;;  %1993 = vmatprep.subr.mxu0 %v806_v44  ;;  %v1215_v59 = vmul.f32 %v2831_v10, %v2826_v16 }
  0xfb   :  { %2021 = vmatprep.subr.mxu1 %v806_v44 }
  0xfc   :  { %v1272_v22 = vsel %vm1235_vm8, %v1215_v59, 0.0  ;;  %v1204_v59 = vmul.f32 %v1172_v37, %v1140_v23 }
  0xfd   :  { %1102 = vperm.xlu1 %2043, %v1093_v2   ;;  %1994 = vmatpush3.xpose.msra.mxu0 %v790_v9  ;;  %v2845_v2 = vld [vmem:[%s3840_s1 + $0x70] sm:$0x3f] }
  0xfe   :  { %1243 = vadd.xlane.f32.xlu0 %v1242_v42  ;;  %2037 = vmatpush3.xpose.msra.mxu1 %v790_v9  ;;  %v2850_v42 = vld [vmem:[%s3841_s2 + $0x70] sm:$0x3f]  ;;  %v1333_v9 = vmul.f32 %v1140_v23, %v1140_v23 }
  0xff   :  { %1995 = vmatprep.subr.mxu0 %v805_v56  ;;  %2022 = vmatprep.subr.mxu1 %v805_v56  ;;  %v1217_v6 = vmul.f32 %v2850_v42, %v2845_v2  ;;  %v2866_v56 = vld [vmem:[%s3840_s1 + $0x88] sm:$0x3f] }
 0x100   :  { %3864 = vst [vmem:[#allocation5_spill] sm:$0xff] %v2866_v56 }
 0x101   :  { %1105 = vperm.xlu1 %2043, %v1094_v13   ;;  %1996 = vmatpush3.xpose.msra.mxu0 %v789_v63  ;;  %v1278_v44 = vsel %vm1235_vm8, %v1217_v6, 0.0  ;;  %v1148_v13 = vld [vmem:[%s3840_s1 + $0x48] sm:$0x3f]  ;;  %v2903_v6 = vld [vmem:[%s3841_s2 + $0x18] sm:$0x3f] }
 0x102   :  { %1249 = vadd.xlane.f32.xlu0 %v1248_v18  ;;  %2038 = vmatpush3.xpose.msra.mxu1 %v789_v63  ;;  %v1367_v18 = vsel %vm1235_vm8, %v1333_v9, 0.0  ;;  %v1341_v1 = vmul.f32 %v1148_v13, %v1148_v13  ;;  %v2871_v63 = vld [vmem:[%s3840_s1] sm:$0x3f]  ;;  %v1461_v9 = vmul.f32 %v1172_v37, %v1172_v37 }
 0x103   :  { %1997 = vmatprep.subr.mxu0 %v804_v55  ;;  %2023 = vmatprep.subr.mxu1 %v804_v55  ;;  %v1349_v55 = vmul.f32 %v2866_v56, %v2866_v56 }
 0x104   :  { %v1391_v36 = vsel %vm1235_vm8, %v1341_v1, 0.0  ;;  %v1180_v1 = vld [vmem:[%s3841_s2 + $0x48] sm:$0x3f] }
 0x105   :  { %1998 = vmatpush3.xpose.msra.mxu0 %v788_v11  ;;  %v1469_v37 = vmul.f32 %v1180_v1, %v1180_v1  ;;  %v1212_v56 = vmul.f32 %v1180_v1, %v1148_v13  ;;  %v2972_v1 = vld [vmem:[%s3840_s1 + $0x68] sm:$0x3f] }
 0x106   :  { %1255 = vadd.xlane.f32.xlu0 %v1254_v50  ;;  %2039 = vmatpush3.xpose.msra.mxu1 %v788_v11  ;;  %v2876_v50 = vld [vmem:[%s3841_s2] sm:$0x3f]  ;;  %v2884_v11 = vld [vmem:[%s3840_s1 + $0xc8] sm:$0x3f] }
 0x107   :  { %1999 = vmatprep.subr.mxu0 %v803_v4  ;;  %2024 = vmatprep.subr.mxu1 %v803_v4  ;;  %3865 = vst [vmem:[#allocation6_spill] sm:$0xff] %v2884_v11  ;;  %v1415_v4 = vsel %vm1235_vm8, %v1349_v55, 0.0  ;;  %v2920_v55 = vld [vmem:[%s3841_s2 + $0x28] sm:$0x3f]  ;;  %v1263_v13 = vsel %vm1235_vm8, %v1212_v56, 0.0 }
 0x108   :  { %3866 = vst [vmem:[#allocation7_spill] sm:$0xff] %v2920_v55 }
 0x109   :  { %2000 = vmatpush3.xpose.msra.mxu0 %v787_v17 }
 0x10a   :  { %1261 = vadd.xlane.f32.xlu0 %v1260_v14  ;;  %2040 = vmatpush3.xpose.msra.mxu1 %v787_v17  ;;  %v1203_v14 = vmul.f32 %v2876_v50, %v2871_v63  ;;  %v1357_v17 = vmul.f32 %v2884_v11, %v2884_v11 }
 0x10e   :  { %1267 = vadd.xlane.f32.xlu0 %v1266_v25  ;;  %v1236_v25 = vsel %vm1235_vm8, %v1203_v14, 0.0  ;;  %v1495_v14 = vsel %vm1235_vm8, %v1461_v9, 0.0  ;;  %v1519_v9 = vsel %vm1235_vm8, %v1469_v37, 0.0 }
 0x112   :  { %1273 = vadd.xlane.f32.xlu0 %v1272_v22  ;;  %v2898_v22 = vld [vmem:[%s3840_s1 + $0x18] sm:$0x3f] }
 0x113   :  { %v1206_v23 = vmul.f32 %v2903_v6, %v2898_v22 }
 0x116   :  { %1279 = vadd.xlane.f32.xlu0 %v1278_v44  ;;  %v1439_v44 = vsel %vm1235_vm8, %v1357_v17, 0.0  ;;  %v1245_v17 = vsel %vm1235_vm8, %v1206_v23, 0.0  ;;  %v2947_v23 = vld [vmem:[%s3841_s2 + $0xc8] sm:$0x3f] }
 0x117   :  { %3870 = vst [vmem:[#allocation11_spill] sm:$0xff] %v2947_v23  ;;  %v1485_v37 = vmul.f32 %v2947_v23, %v2947_v23 }
 0x11a   :  { %1368 = vadd.xlane.f32.xlu0 %v1367_v18  ;;  %v1239_v18 = vsel %vm1235_vm8, %v1204_v59, 0.0  ;;  %v2934_v59 = vld [vmem:[%s3840_s1 + $0x38] sm:$0x3f] }
 0x11b   :  { %3868 = vst [vmem:[#allocation9_spill] sm:$0xff] %v2934_v59 }
 0x11e   :  { %1392 = vadd.xlane.f32.xlu0 %v1391_v36  ;;  %v2915_v36 = vld [vmem:[%s3840_s1 + $0x28] sm:$0x3f] }
 0x122   :  { %1416 = vadd.xlane.f32.xlu0 %v1415_v4  ;;  %v2926_v4 = vld [vmem:[%s3841_s2 + $0x88] sm:$0x3f] }
 0x123   :  { %3867 = vst [vmem:[#allocation8_spill] sm:$0xff] %v2926_v4 }
 0x125   :  { %1237 = vadd.xlane.f32.xlu1 %v1236_v25  ;;  %v1208_v25 = vmul.f32 %v2920_v55, %v2915_v36 }
 0x126   :  { %1440 = vadd.xlane.f32.xlu0 %v1439_v44  ;;  %v2939_v44 = vld [vmem:[%s3841_s2 + $0x38] sm:$0x3f] }
 0x127   :  { %3869 = vst [vmem:[#allocation10_spill] sm:$0xff] %v2939_v44  ;;  %v1210_v11 = vmul.f32 %v2939_v44, %v2934_v59  ;;  %v1470_v44 = vmul.f32 %v2812_v0, %v2812_v0  ;;  %v1197_v59 = vld [vmem:[%s3841_s2 + $0xd0] sm:$0x3f]  ;;  %v1340_v0 = vmul.f32 %v2788_v24, %v2788_v24  ;;  %v3011_v24 = vld [vmem:[%s3840_s1 + $0xc0] sm:$0x3f] }
 0x128   :  { %3872 = vst [vmem:[#allocation13_spill] sm:$0xff] %v3011_v24 }
 0x129   :  { %1240 = vadd.xlane.f32.xlu1 %v1239_v18  ;;  %v1477_v18 = vmul.f32 %v2926_v4, %v2926_v4  ;;  %v1257_v4 = vsel %vm1235_vm8, %v1210_v11, 0.0 }
 0x12a   :  { %1496 = vadd.xlane.f32.xlu0 %v1495_v14  ;;  %v1251_v14 = vsel %vm1235_vm8, %v1208_v25, 0.0  ;;  %v1182_v25 = vld [vmem:[%s3841_s2 + $0x58] sm:$0x3f] }
 0x12b   :  { %v1543_v55 = vsel %vm1235_vm8, %v1477_v18, 0.0  ;;  %v1342_v18 = vmul.f32 %v2807_v58, %v2807_v58 }
 0x12d   :  { %1246 = vadd.xlane.f32.xlu1 %v1245_v17  ;;  %v1150_v17 = vld [vmem:[%s3840_s1 + $0x58] sm:$0x3f]  ;;  %v1394_v58 = vsel %vm1235_vm8, %v1342_v18, 0.0 }
 0x12e   :  { %1520 = vadd.xlane.f32.xlu0 %v1519_v9  ;;  %v1567_v9 = vsel %vm1235_vm8, %v1485_v37, 0.0  ;;  %v1214_v11 = vmul.f32 %v1182_v25, %v1150_v17 }
 0x131   :  { %1252 = vadd.xlane.f32.xlu1 %v1251_v14  ;;  %v1165_v14 = vld [vmem:[%s3840_s1 + $0xd0] sm:$0x3f] }
 0x132   :  { %1544 = vadd.xlane.f32.xlu0 %v1543_v55  ;;  %v2977_v55 = vld [vmem:[%s3841_s2 + $0x68] sm:$0x3f]  ;;  %v1358_v37 = vmul.f32 %v1165_v14, %v1165_v14  ;;  %v1332_v14 = vmul.f32 %v2871_v63, %v2871_v63  ;;  %v1166_v63 = vld [vmem:[%s3840_s1 + $0xd8] sm:$0x3f] }
 0x133   :  { %v1216_v56 = vmul.f32 %v2977_v55, %v2972_v1 }
 0x135   :  { %1258 = vadd.xlane.f32.xlu1 %v1257_v4  ;;  %v1269_v4 = vsel %vm1235_vm8, %v1214_v11, 0.0  ;;  %v1275_v18 = vsel %vm1235_vm8, %v1216_v56, 0.0  ;;  %v1486_v11 = vmul.f32 %v1197_v59, %v1197_v59  ;;  %v1343_v56 = vmul.f32 %v1150_v17, %v1150_v17 }
 0x136   :  { %1568 = vadd.xlane.f32.xlu0 %v1567_v9  ;;  %v1442_v9 = vsel %vm1235_vm8, %v1358_v37, 0.0  ;;  %v2999_v37 = vld [vmem:[%s3840_s1 + $0x80] sm:$0x3f]  ;;  %v1388_v59 = vsel %vm1235_vm8, %v1340_v0, 0.0 }
 0x137   :  { %3871 = vst [vmem:[#allocation12_spill] sm:$0xff] %v2999_v37 }
 0x139   :  { %1264 = vadd.xlane.f32.xlu1 %v1263_v13  ;;  %v1522_v13 = vsel %vm1235_vm8, %v1470_v44, 0.0  ;;  %v1348_v44 = vmul.f32 %v2999_v37, %v2999_v37 }
 0x13a   :  { %1395 = vadd.xlane.f32.xlu0 %v1394_v58  ;;  %v1364_v58 = vsel %vm1235_vm8, %v1332_v14, 0.0  ;;  %v1356_v14 = vmul.f32 %v3011_v24, %v3011_v24  ;;  %v1472_v24 = vmul.f32 %v2831_v10, %v2831_v10 }
 0x13b   :  { %v1412_v17 = vsel %vm1235_vm8, %v1348_v44, 0.0 }
 0x13c   :  { %v1436_v0 = vsel %vm1235_vm8, %v1356_v14, 0.0 }
 0x13d   :  { %1270 = vadd.xlane.f32.xlu1 %v1269_v4  ;;  %v1570_v4 = vsel %vm1235_vm8, %v1486_v11, 0.0  ;;  %v1471_v11 = vmul.f32 %v1182_v25, %v1182_v25  ;;  %v3028_v25 = vld [vmem:[%s3841_s2 + $0x80] sm:$0x3f] }
 0x13e   :  { %1443 = vadd.xlane.f32.xlu0 %v1442_v9  ;;  %v1397_v9 = vsel %vm1235_vm8, %v1343_v56, 0.0  ;;  %3873 = vst [vmem:[#allocation14_spill] sm:$0xff] %v3028_v25 }
 0x141   :  { %1276 = vadd.xlane.f32.xlu1 %v1275_v18  ;;  %v1359_v18 = vmul.f32 %v1166_v63, %v1166_v63 }
 0x142   :  { %1523 = vadd.xlane.f32.xlu0 %v1522_v13 }
 0x143   :  { %v1445_v13 = vsel %vm1235_vm8, %v1359_v18, 0.0 }
 0x145   :  { %1365 = vadd.xlane.f32.xlu1 %v1364_v58  ;;  %v1198_v58 = vld [vmem:[%s3841_s2 + $0xd8] sm:$0x3f] }
 0x146   :  { %1571 = vadd.xlane.f32.xlu0 %v1570_v4  ;;  %v1460_v4 = vmul.f32 %v2876_v50, %v2876_v50  ;;  %v1487_v44 = vmul.f32 %v1198_v58, %v1198_v58  ;;  %v1476_v58 = vmul.f32 %v3028_v25, %v3028_v25  ;;  %v1345_v25 = vmul.f32 %v2972_v1, %v2972_v1 }
 0x148   :  { %v1492_v18 = vsel %vm1235_vm8, %v1460_v4, 0.0 }
 0x149   :  { %1389 = vadd.xlane.f32.xlu1 %v1388_v59  ;;  %v1525_v59 = vsel %vm1235_vm8, %v1471_v11, 0.0  ;;  %v1344_v11 = vmul.f32 %v2826_v16, %v2826_v16  ;;  %v1157_v16 = vld [vmem:[%s3840_s1 + $0x90] sm:$0x3f] }
 0x14a   :  { %1398 = vadd.xlane.f32.xlu0 %v1397_v9 }
 0x14d   :  { %1413 = vadd.xlane.f32.xlu1 %v1412_v17  ;;  %v1468_v17 = vmul.f32 %v2793_v26, %v2793_v26 }
 0x14e   :  { %v594_v56 = vpop.xlane.xlu0 %593  ;;  %1446 = vadd.xlane.f32.xlu0 %v1445_v13  ;;  %v1573_v13 = vsel %vm1235_vm8, %v1487_v44, 0.0 }
 0x14f   :  { %v601_v63 = vmul.f32 0.0078125, %v594_v56  ;;  %v1516_v26 = vsel %vm1235_vm8, %v1468_v17, 0.0  ;;  %v3045_v56 = vld [vmem:[%s3841_s2 + $0xc0] sm:$0x3f] }
 0x150   :  { %3874 = vst [vmem:[#allocation15_spill] sm:$0xff] %v3045_v56  ;;  %v1484_v17 = vmul.f32 %v3045_v56, %v3045_v56 }
 0x151   :  { %1437 = vadd.xlane.f32.xlu1 %v1436_v0  ;;  %v605_v9 = vadd.f32 1e-05, %v601_v63  ;;  %v1167_v0 = vld [vmem:[%s3840_s1 + $0xe0] sm:$0x3f]  ;;  %v1189_v63 = vld [vmem:[%s3841_s2 + $0x90] sm:$0x3f] }
 0x152   :  { %v596_v14 = vpop.xlane.xlu0 %595  ;;  %1526 = vadd.xlane.f32.xlu0 %v1525_v59  ;;  %v1400_v59 = vsel %vm1235_vm8, %v1344_v11, 0.0  ;;  %v1360_v44 = vmul.f32 %v1167_v0, %v1167_v0  ;;  %v1200_v11 = vld [vmem:[%s3841_s2 + $0xe8] sm:$0x3f]  ;;  %v1462_v0 = vmul.f32 %v2734_v15, %v2734_v15 }
 0x153   :  { %2044 = vrsqrt.f32 %v605_v9  ;;  %v602_v50 = vmul.f32 0.0078125, %v596_v14  ;;  %v1540_v9 = vsel %vm1235_vm8, %v1476_v58, 0.0  ;;  %v1334_v14 = vmul.f32 %v2729_v8, %v2729_v8 }
 0x154   :  { %v1350_v58 = vmul.f32 %v1157_v16, %v1157_v16  ;;  %v1335_v8 = vmul.f32 %v2898_v22, %v2898_v22  ;;  %v1448_v56 = vsel %vm1235_vm8, %v1360_v44, 0.0  ;;  %v1473_v16 = vmul.f32 %v2977_v55, %v2977_v55 }
 0x155   :  { %1493 = vadd.xlane.f32.xlu1 %v1492_v18  ;;  %v606_v4 = vadd.f32 1e-05, %v602_v50  ;;  %v1158_v18 = vld [vmem:[%s3840_s1 + $0x98] sm:$0x3f]  ;;  %v1199_v50 = vld [vmem:[%s3841_s2 + $0xe0] sm:$0x3f]  ;;  %v1489_v15 = vmul.f32 %v1200_v11, %v1200_v11 }
 0x156   :  { %1574 = vadd.xlane.f32.xlu0 %v1573_v13  ;;  %v1168_v13 = vld [vmem:[%s3840_s1 + $0xe8] sm:$0x3f]  ;;  %v1488_v37 = vmul.f32 %v1199_v50, %v1199_v50  ;;  %v1370_v22 = vsel %vm1235_vm8, %v1334_v14, 0.0  ;;  %v3086_v44 = vsel %vm1235_vm8, %v1462_v0, 0.0  ;;  %v3092_v1 = vsel %vm1235_vm8, %v1335_v8, 0.0 }
 0x157   :  { %2046 = vrsqrt.f32 %v606_v4  ;;  %v1478_v4 = vmul.f32 %v1189_v63, %v1189_v63  ;;  %v1361_v23 = vmul.f32 %v1168_v13, %v1168_v13  ;;  %v1564_v63 = vsel %vm1235_vm8, %v1484_v17, 0.0 }
 0x158   :  { %v1403_v17 = vsel %vm1235_vm8, %v1345_v25, 0.0  ;;  %v1576_v50 = vsel %vm1235_vm8, %v1488_v37, 0.0  ;;  %v3108_v11 = vsel %vm1235_vm8, %v1473_v16, 0.0 }
 0x159   :  { %1517 = vadd.xlane.f32.xlu1 %v1516_v26  ;;  %v1351_v26 = vmul.f32 %v1158_v18, %v1158_v18  ;;  %v3089_v10 = vsel %vm1235_vm8, %v1478_v4, 0.0  ;;  %v1528_v18 = vsel %vm1235_vm8, %v1472_v24, 0.0  ;;  %v3105_v13 = vsel %vm1235_vm8, %v1361_v23, 0.0  ;;  %v3116_v24 = vld [vmem:[%s3842_s7] ss:$0 sm:$0xff] }
 0x15a   :  { %1401 = vadd.xlane.f32.xlu0 %v1400_v59  ;;  %v1418_v59 = vsel %vm1235_vm8, %v1350_v58, 0.0 }
 0x15b   :  { %v3095_v55 = vsel %vm1235_vm8, %v1351_v26, 0.0 }
 0x15d   :  { %1541 = vadd.xlane.f32.xlu1 %v1540_v9  ;;  %v3099_v9 = vmul.f32 %v2903_v6, %v2903_v6 }
 0x15e   :  { %1449 = vadd.xlane.f32.xlu0 %v1448_v56  ;;  %v3111_v56 = vsel %vm1235_vm8, %v1489_v15, 0.0 }
 0x160   :  { %v2045_v14 = vpop.eup %2044 }
 0x161   :  { %1565 = vadd.xlane.f32.xlu1 %v1564_v63  ;;  %v617_v58 = vrot.slane %v2045_v14, 1  ;;  %v618_v6 = vrot.slane %v2045_v14, 2  ;;  %v619_v0 = vrot.slane %v2045_v14, 3  ;;  %v620_v4 = vrot.slane %v2045_v14, 4 }
 0x162   :  { %v621_v37 = vrot.slane %v2045_v14, 5  ;;  %v622_v25 = vrot.slane %v2045_v14, 6  ;;  %v623_v23 = vrot.slane %v2045_v14, 7  ;;  %v677_v8 = vmul.f32 %v2045_v14, %v2496_v29  ;;  %1529 = vadd.xlane.f32.xlu0 %v1528_v18 }
 0x163   :  { %v678_v26 = vmul.f32 %v617_v58, %v2499_v30  ;;  %v679_v16 = vmul.f32 %v618_v6, %v2502_v62  ;;  %v680_v15 = vmul.f32 %v619_v0, %v2505_v31  ;;  %v681_v63 = vmul.f32 %v620_v4, %v2508_v32 }
 0x164   :  { %v682_v21 = vmul.f32 %v621_v37, %v2511_v33  ;;  %v683_v61 = vmul.f32 %v622_v25, %v2514_v34  ;;  %v684_v29 = vmul.f32 %v623_v23, %v2522_v60  ;;  %v716_v18 = vmul.f32 %v3116_v24, %v677_v8  ;;  %v2047_v30 = vpop.eup %2046 }
 0x165   :  { %1371 = vadd.xlane.f32.xlu1 %v1370_v22  ;;  %v717_v62 = vmul.f32 %v3116_v24, %v678_v26  ;;  %v718_v31 = vmul.f32 %v3116_v24, %v679_v16  ;;  %v719_v32 = vmul.f32 %v3116_v24, %v680_v15  ;;  %v720_v14 = vmul.f32 %v3116_v24, %v681_v63 }
 0x166   :  { %v721_v58 = vmul.f32 %v3116_v24, %v682_v21  ;;  %v722_v33 = vmul.f32 %v3116_v24, %v683_v61  ;;  %v723_v34 = vmul.f32 %v3116_v24, %v684_v29  ;;  %v755_v60 = vadd.f32 %v3126_v3, %v716_v18  ;;  %1577 = vadd.xlane.f32.xlu0 %v1576_v50 }
 0x167   :  { %v756_v6 = vadd.f32 %v3126_v3, %v717_v62  ;;  %v757_v22 = vadd.f32 %v3126_v3, %v718_v31  ;;  %v758_v0 = vadd.f32 %v3126_v3, %v719_v32  ;;  %v759_v4 = vadd.f32 %v3126_v3, %v720_v14 }
 0x168   :  { %v760_v37 = vadd.f32 %v3126_v3, %v721_v58  ;;  %v761_v25 = vadd.f32 %v3126_v3, %v722_v33  ;;  %v762_v21 = vadd.f32 %v3126_v3, %v723_v34  ;;  %v624_v61 = vrot.slane %v2047_v30, 1 }
 0x169   :  { %1419 = vadd.xlane.f32.xlu1 %v1418_v59  ;;  %v863_v23 = vrot.slane %v756_v6, 7  ;;  %v865_v8 = vrot.slane %v757_v22, 6  ;;  %v867_v26 = vrot.slane %v758_v0, 5  ;;  %v869_v50 = vrot.slane %v759_v4, 4 }
 0x16a   :  { %v871_v16 = vrot.slane %v760_v37, 3  ;;  %v873_v15 = vrot.slane %v761_v25, 2  ;;  %v875_v63 = vrot.slane %v762_v21, 1  ;;  %v625_v29 = vrot.slane %v2047_v30, 2  ;;  %1404 = vadd.xlane.f32.xlu0 %v1403_v17 }
 0x16b   :  { %v864_v18 = vsel %vm321_vm1, %v863_v23, %v755_v60  ;;  %v626_v62 = vrot.slane %v2047_v30, 3  ;;  %v627_v31 = vrot.slane %v2047_v30, 4  ;;  %v628_v32 = vrot.slane %v2047_v30, 5  ;;  %v1169_v23 = vld [vmem:[%s3840_s1 + $0xf0] sm:$0x3f] }
 0x16c   :  { %v866_v14 = vsel %vm323_vm2, %v865_v8, %v864_v18  ;;  %v629_v58 = vrot.slane %v2047_v30, 6  ;;  %v630_v33 = vrot.slane %v2047_v30, 7  ;;  %v685_v59 = vmul.f32 %v2047_v30, %v2472_v43 }
 0x16d   :  { %1499 = vadd.xlane.f32.xlu1 %v3086_v44  ;;  %v598_v34 = vpop.xlane.xlu1 %597  ;;  %v868_v6 = vsel %vm325_vm3, %v867_v26, %v866_v14  ;;  %v686_v22 = vmul.f32 %v624_v61, %v2466_v38  ;;  %v687_v17 = vmul.f32 %v625_v29, %v2469_v40  ;;  %v688_v60 = vmul.f32 %v626_v62, %v2477_v48 }
 0x16e   :  { %v603_v0 = vmul.f32 0.0078125, %v598_v34  ;;  %v870_v4 = vsel %vm327_vm4, %v869_v50, %v868_v6  ;;  %v689_v37 = vmul.f32 %v627_v31, %v2484_v54  ;;  %v690_v25 = vmul.f32 %v628_v32, %v2490_v5  ;;  %1452 = vadd.xlane.f32.xlu0 %v3105_v13  ;;  %v1190_v50 = vld [vmem:[%s3841_s2 + $0x98] sm:$0x3f]  ;;  %v1159_v31 = vld [vmem:[%s3840_s1 + $0xa0] sm:$0x3f] }
 0x16f   :  { %v872_v43 = vsel %vm329_vm5, %v871_v16, %v870_v4  ;;  %v691_v44 = vmul.f32 %v629_v58, %v2517_v53  ;;  %v692_v30 = vmul.f32 %v630_v33, %v2540_v51  ;;  %v724_v38 = vmul.f32 %v3116_v24, %v685_v59 }
 0x170   :  { %v607_v40 = vadd.f32 1e-05, %v603_v0  ;;  %v874_v48 = vsel %vm331_vm6, %v873_v15, %v872_v43  ;;  %v725_v21 = vmul.f32 %v3116_v24, %v686_v22  ;;  %v726_v61 = vmul.f32 %v3116_v24, %v687_v17  ;;  %v1170_v43 = vld [vmem:[%s3840_s1 + $0xf8] sm:$0x3f] }
 0x171   :  { %1547 = vadd.xlane.f32.xlu1 %v3089_v10  ;;  %v600_v54 = vpop.xlane.xlu1 %599  ;;  %v876_v5 = vsel %vm333_vm7, %v875_v63, %v874_v48  ;;  %v727_v13 = vmul.f32 %v3116_v24, %v688_v60  ;;  %v728_v53 = vmul.f32 %v3116_v24, %v689_v37  ;;  %v729_v51 = vmul.f32 %v3116_v24, %v690_v25 }
 0x172   :  { %2048 = vrsqrt.f32 %v607_v40  ;;  %v604_v8 = vmul.f32 0.0078125, %v600_v54  ;;  %2001 = vmatprep.mubr.f32.mxu0 %v876_v5  ;;  %v730_v26 = vmul.f32 %v3116_v24, %v691_v44  ;;  %1532 = vadd.xlane.f32.xlu0 %v3108_v11  ;;  %v1346_v10 = vmul.f32 %v2845_v2, %v2845_v2 }
 0x173   :  { %2002 = vmatmul.mubr.f32.vlgmr.msra.gmra.mxu0 %v876_v5  ;;  %v731_v16 = vmul.f32 %v3116_v24, %v692_v30  ;;  %v764_v15 = vadd.f32 %v3126_v3, %v725_v21  ;;  %v765_v63 = vadd.f32 %v3126_v3, %v726_v61  ;;  %v766_v29 = vadd.f32 %v3126_v3, %v727_v13 }
 0x174   :  { %v608_v18 = vadd.f32 1e-05, %v604_v8  ;;  %v1501_v11 = vsel %vm1235_vm8, %v3099_v9, 0.0  ;;  %v767_v62 = vadd.f32 %v3126_v3, %v728_v53  ;;  %v1362_v2 = vmul.f32 %v1169_v23, %v1169_v23  ;;  %v1191_v9 = vld [vmem:[%s3841_s2 + $0xa0] sm:$0x3f] }
 0x175   :  { %1374 = vadd.xlane.f32.xlu1 %v3092_v1  ;;  %v763_v32 = vadd.f32 %v3126_v3, %v724_v38  ;;  %v768_v14 = vadd.f32 %v3126_v3, %v729_v51  ;;  %v877_v58 = vrot.slane %v764_v15, 7  ;;  %v879_v33 = vrot.slane %v765_v63, 6  ;;  %v1186_v23 = vld [vmem:[%s3841_s2 + $0x78] sm:$0x3f] }
 0x176   :  { %v1479_v59 = vmul.f32 %v1190_v50, %v1190_v50  ;;  %v1336_v34 = vmul.f32 %v2750_v19, %v2750_v19  ;;  %v769_v1 = vadd.f32 %v3126_v3, %v730_v26  ;;  %1580 = vadd.xlane.f32.xlu0 %v3111_v56  ;;  %v1406_v6 = vsel %vm1235_vm8, %v1346_v10, 0.0  ;;  %v1201_v19 = vld [vmem:[%s3841_s2 + $0xf0] sm:$0x3f]  ;;  %v1154_v56 = vld [vmem:[%s3840_s1 + $0x78] sm:$0x3f] }
 0x177   :  { %2050 = vrsqrt.f32 %v608_v18  ;;  %v770_v22 = vadd.f32 %v3126_v3, %v731_v16  ;;  %v878_v17 = vsel %vm321_vm1, %v877_v58, %v763_v32  ;;  %v881_v60 = vrot.slane %v766_v29, 5  ;;  %v1202_v8 = vld [vmem:[%s3841_s2 + $0xf8] sm:$0x3f] }
 0x178   :  { %v1352_v0 = vmul.f32 %v1159_v31, %v1159_v31  ;;  %v1464_v4 = vmul.f32 %v2755_v20, %v2755_v20  ;;  %v880_v37 = vsel %vm323_vm2, %v879_v33, %v878_v17  ;;  %v883_v25 = vrot.slane %v767_v62, 4 }
 0x179   :  { %1422 = vadd.xlane.f32.xlu1 %v3095_v55  ;;  %v1480_v44 = vmul.f32 %v1191_v9, %v1191_v9  ;;  %v882_v30 = vsel %vm325_vm3, %v881_v60, %v880_v37  ;;  %v885_v38 = vrot.slane %v768_v14, 3  ;;  %v1454_v40 = vsel %vm1235_vm8, %v1362_v2, 0.0 }
 0x17a   :  { %v884_v20 = vsel %vm327_vm4, %v883_v25, %v882_v30  ;;  %v887_v48 = vrot.slane %v769_v1, 2  ;;  %1407 = vadd.xlane.f32.xlu0 %v1406_v6  ;;  %v1474_v21 = vmul.f32 %v2850_v42, %v2850_v42  ;;  %v1490_v61 = vmul.f32 %v1201_v19, %v1201_v19  ;;  %v3255_v1 = vpop.permute.xlu0 %1096 }
 0x17b   :  { %v886_v54 = vsel %vm329_vm5, %v885_v38, %v884_v20  ;;  %v889_v5 = vrot.slane %v770_v22, 1  ;;  %v1347_v13 = vmul.f32 %v1154_v56, %v1154_v56  ;;  %v1363_v53 = vmul.f32 %v1170_v43, %v1170_v43 }
 0x17c   :  { %v1549_v55 = vsel %vm1235_vm8, %v1479_v59, 0.0  ;;  %v888_v51 = vsel %vm331_vm6, %v887_v48, %v886_v54  ;;  %v1376_v42 = vsel %vm1235_vm8, %v1336_v34, 0.0  ;;  %v1424_v26 = vsel %vm1235_vm8, %v1352_v0, 0.0 }
 0x17d   :  { %1502 = vadd.xlane.f32.xlu1 %v1501_v11  ;;  %v3234_v10 = vsel %vm1235_vm8, %v1464_v4, 0.0  ;;  %v890_v50 = vsel %vm333_vm7, %v889_v5, %v888_v51  ;;  %v3238_v16 = vsel %vm1235_vm8, %v1480_v44, 0.0  ;;  %v3242_v15 = vmul.f32 %v2915_v36, %v2915_v36 }
 0x17e   :  { %2003 = vmatprep.mubr.f32.mxu0 %v890_v50  ;;  %1455 = vadd.xlane.f32.xlu0 %v1454_v40  ;;  %v1534_v63 = vsel %vm1235_vm8, %v1474_v21, 0.0  ;;  %v1582_v29 = vsel %vm1235_vm8, %v1490_v61, 0.0  ;;  %v1409_v11 = vsel %vm1235_vm8, %v1347_v13, 0.0  ;;  %v3248_v62 = vsel %vm1235_vm8, %v1363_v53, 0.0 }
 0x17f   :  { %v2049_v18 = vpop.eup %2048  ;;  %2004 = vmatmul.mubr.f32.gmra.mxu0 %v890_v50  ;;  %v3250_v2 = vmul.f32 %v1186_v23, %v1186_v23  ;;  %v3252_v31 = vmul.f32 %v1202_v8, %v1202_v8 }
 0x180   :  { %v631_v32 = vrot.slane %v2049_v18, 1  ;;  %v632_v14 = vrot.slane %v2049_v18, 2  ;;  %v633_v36 = vrot.slane %v2049_v18, 3  ;;  %v634_v58 = vrot.slane %v2049_v18, 4 }
 0x181   :  { %1550 = vadd.xlane.f32.xlu1 %v1549_v55  ;;  %v635_v33 = vrot.slane %v2049_v18, 5  ;;  %v636_v59 = vrot.slane %v2049_v18, 6  ;;  %v637_v34 = vrot.slane %v2049_v18, 7  ;;  %v693_v9 = vmul.f32 %v2049_v18, %v2618_v27 }
 0x182   :  { %v694_v6 = vmul.f32 %v631_v32, %v2621_v35  ;;  %v695_v22 = vmul.f32 %v632_v14, %v2624_v39  ;;  %v696_v17 = vmul.f32 %v633_v36, %v2627_v46  ;;  %v697_v60 = vmul.f32 %v634_v58, %v2630_v49  ;;  %1535 = vadd.xlane.f32.xlu0 %v1534_v63 }
 0x183   :  { %v698_v19 = vmul.f32 %v635_v33, %v2633_v52  ;;  %v699_v0 = vmul.f32 %v636_v59, %v2636_v28  ;;  %v700_v4 = vmul.f32 %v637_v34, %v2644_v47  ;;  %v732_v37 = vmul.f32 %v3116_v24, %v693_v9  ;;  %v3875_v9 = vld [vmem:[#allocation2_spill] sm:$0xff] }
 0x184   :  { %v2051_v27 = vpop.eup %2050  ;;  %v733_v25 = vmul.f32 %v3116_v24, %v694_v6  ;;  %v734_v35 = vmul.f32 %v3116_v24, %v695_v22  ;;  %v735_v39 = vmul.f32 %v3116_v24, %v696_v17  ;;  %v736_v46 = vmul.f32 %v3116_v24, %v697_v60  ;;  %v3876_v22 = vld [vmem:[#allocation3_spill] sm:$0xff]  ;;  %v3877_v60 = vld [vmem:[#allocation4_spill] sm:$0xff] }
 0x185   :  { %1377 = vadd.xlane.f32.xlu1 %v1376_v42  ;;  %v737_v49 = vmul.f32 %v3116_v24, %v698_v19  ;;  %v738_v52 = vmul.f32 %v3116_v24, %v699_v0  ;;  %v739_v28 = vmul.f32 %v3116_v24, %v700_v4  ;;  %v771_v47 = vadd.f32 %v3126_v3, %v732_v37  ;;  %v3308_v4 = vld [vmem:[%s3840_s1 + $0xa8] sm:$0x3f] }
 0x186   :  { %v772_v56 = vadd.f32 %v3126_v3, %v733_v25  ;;  %v773_v43 = vadd.f32 %v3126_v3, %v734_v35  ;;  %v774_v44 = vadd.f32 %v3126_v3, %v735_v39  ;;  %v775_v30 = vadd.f32 %v3126_v3, %v736_v46  ;;  %1583 = vadd.xlane.f32.xlu0 %v1582_v29 }
 0x187   :  { %v776_v38 = vadd.f32 %v3126_v3, %v737_v49  ;;  %v777_v40 = vadd.f32 %v3126_v3, %v738_v52  ;;  %v778_v20 = vadd.f32 %v3126_v3, %v739_v28  ;;  %v638_v48 = vrot.slane %v2051_v27, 1  ;;  %v3280_v21 = vpop.xlane.xlu0 %1243 }
 0x188   :  { %v891_v61 = vrot.slane %v772_v56, 7  ;;  %v893_v54 = vrot.slane %v773_v43, 6  ;;  %v895_v5 = vrot.slane %v774_v44, 5  ;;  %v897_v13 = vrot.slane %v775_v30, 4 }
 0x189   :  { %1425 = vadd.xlane.f32.xlu1 %v1424_v26  ;;  %v899_v53 = vrot.slane %v776_v38, 3  ;;  %v901_v55 = vrot.slane %v777_v40, 2  ;;  %v903_v51 = vrot.slane %v778_v20, 1  ;;  %v639_v23 = vrot.slane %v2051_v27, 2  ;;  %v3878_v38 = vld [vmem:[#allocation5_spill] sm:$0xff]  ;;  %v3879_v40 = vld [vmem:[#allocation8_spill] sm:$0xff] }
 0x18a   :  { %v892_v8 = vsel %vm321_vm1, %v891_v61, %v771_v47  ;;  %v640_v42 = vrot.slane %v2051_v27, 3  ;;  %v641_v50 = vrot.slane %v2051_v27, 4  ;;  %v642_v63 = vrot.slane %v2051_v27, 5  ;;  %1410 = vadd.xlane.f32.xlu0 %v1409_v11 }
 0x18b   :  { %v894_v29 = vsel %vm323_vm2, %v893_v54, %v892_v8  ;;  %v643_v18 = vrot.slane %v2051_v27, 6  ;;  %v644_v32 = vrot.slane %v2051_v27, 7  ;;  %v701_v14 = vmul.f32 %v2051_v27, %v2572_v45  ;;  %v3285_v36 = vpop.xlane.xlu0 %1249  ;;  %v3346_v8 = vld [vmem:[%s3841_s2 + $0xa8] sm:$0x3f] }
 0x18c   :  { %v896_v26 = vsel %vm325_vm3, %v895_v5, %v894_v29  ;;  %v702_v58 = vmul.f32 %v638_v48, %v2563_v7  ;;  %v703_v33 = vmul.f32 %v639_v23, %v2568_v41  ;;  %v704_v59 = vmul.f32 %v640_v42, %v2578_v12  ;;  %v3881_v29 = vld [vmem:[#allocation6_spill] sm:$0xff] }
 0x18d   :  { %1505 = vadd.xlane.f32.xlu1 %v3234_v10  ;;  %v898_v11 = vsel %vm327_vm4, %v897_v13, %v896_v26  ;;  %v705_v34 = vmul.f32 %v641_v50, %v2592_v57  ;;  %v706_v6 = vmul.f32 %v642_v63, %v3875_v9  ;;  %v707_v45 = vmul.f32 %v643_v18, %v3876_v22  ;;  %v3882_v18 = vld [vmem:[#allocation11_spill] sm:$0xff]  ;;  %v3362_v9 = vpop.permute.xlu1 %1099 }
 0x18e   :  { %v900_v17 = vsel %vm329_vm5, %v899_v53, %v898_v11  ;;  %v708_v19 = vmul.f32 %v644_v32, %v3877_v60  ;;  %v740_v7 = vmul.f32 %v3116_v24, %v701_v14  ;;  %v741_v41 = vmul.f32 %v3116_v24, %v702_v58  ;;  %1458 = vadd.xlane.f32.xlu0 %v3248_v62  ;;  %v3372_v60 = vld [vmem:[%s3840_s1 + $0xb0] sm:$0x3f] }
 0x18f   :  { %v902_v12 = vsel %vm331_vm6, %v901_v55, %v900_v17  ;;  %v742_v10 = vmul.f32 %v3116_v24, %v703_v33  ;;  %v743_v57 = vmul.f32 %v3116_v24, %v704_v59  ;;  %v744_v0 = vmul.f32 %v3116_v24, %v705_v34  ;;  %v3310_v37 = vpop.xlane.xlu0 %1255  ;;  %v3880_v55 = vld [vmem:[#allocation7_spill] sm:$0xff] }
 0x190   :  { %v904_v27 = vsel %vm333_vm7, %v903_v51, %v902_v12  ;;  %v745_v25 = vmul.f32 %v3116_v24, %v706_v6  ;;  %v746_v62 = vmul.f32 %v3116_v24, %v707_v45  ;;  %v1537_v35 = vsel %vm1235_vm8, %v3250_v2, 0.0  ;;  %v2140_v45 = vld [vmem:[%s3840_s1 + $0x30] sm:$0x3f] }
 0x191   :  { %1553 = vadd.xlane.f32.xlu1 %v3238_v16  ;;  %2005 = vmatprep.mubr.f32.mxu1 %v904_v27  ;;  %v747_v39 = vmul.f32 %v3116_v24, %v708_v19  ;;  %v780_v46 = vadd.f32 %v3126_v3, %v741_v41  ;;  %v781_v49 = vadd.f32 %v3126_v3, %v742_v10  ;;  %v1379_v52 = vsel %vm1235_vm8, %v3242_v15, 0.0  ;;  %v3377_v41 = vpop.permute.xlu1 %1102 }
 0x192   :  { %2006 = vmatmul.mubr.f32.vlgmr.msra.gmra.mxu1 %v904_v27  ;;  %v782_v28 = vadd.f32 %v3126_v3, %v743_v57  ;;  %v783_v47 = vadd.f32 %v3126_v3, %v744_v0  ;;  %v1353_v2 = vmul.f32 %v3308_v4, %v3308_v4  ;;  %v779_v16 = vadd.f32 %v3126_v3, %v740_v7  ;;  %v2141_v0 = vld [vmem:[%s3841_s2 + $0x30] sm:$0x3f] }
 0x193   :  { %v784_v56 = vadd.f32 %v3126_v3, %v745_v25  ;;  %v905_v24 = vrot.slane %v780_v46, 7  ;;  %v907_v43 = vrot.slane %v781_v49, 6  ;;  %v3329_v44 = vpop.xlane.xlu0 %1261  ;;  %1538 = vadd.xlane.f32.xlu0 %v1537_v35  ;;  %v785_v30 = vadd.f32 %v3126_v3, %v746_v62  ;;  %v3388_v25 = vld [vmem:[%s3841_s2 + $0xb0] sm:$0x3f] }
 0x194   :  { %v1585_v15 = vsel %vm1235_vm8, %v3252_v31, 0.0  ;;  %v1220_v20 = vmul.f32 %v3879_v40, %v3878_v38  ;;  %v786_v48 = vadd.f32 %v3126_v3, %v747_v39  ;;  %v909_v54 = vrot.slane %v782_v28, 5 }
 0x195   :  { %1380 = vadd.xlane.f32.xlu1 %v1379_v52  ;;  %v906_v61 = vsel %vm321_vm1, %v905_v24, %v779_v16  ;;  %v911_v13 = vrot.slane %v783_v47, 4  ;;  %v1427_v53 = vsel %vm1235_vm8, %v1353_v2, 0.0  ;;  %v1465_v51 = vmul.f32 %v3880_v55, %v3880_v55  ;;  %v3390_v35 = vpop.permute.xlu1 %1105  ;;  %v3883_v47 = vld [vmem:[#allocation9_spill] sm:$0xff] }
 0x196   :  { %v908_v5 = vsel %vm323_vm2, %v907_v43, %v906_v61  ;;  %v913_v31 = vrot.slane %v784_v56, 3  ;;  %v915_v50 = vrot.slane %v785_v30, 2  ;;  %v1287_v63 = vsel %vm1235_vm8, %v1220_v20, 0.0  ;;  %v3403_v16 = vld [vmem:[%s3840_s1 + $0xb8] sm:$0x3f]  ;;  %v3884_v61 = vld [vmem:[#allocation10_spill] sm:$0xff] }
 0x197   :  { %v910_v23 = vsel %vm325_vm3, %v909_v54, %v908_v5  ;;  %v3348_v3 = vpop.xlane.xlu0 %1267  ;;  %1586 = vadd.xlane.f32.xlu0 %v1585_v15  ;;  %v1228_v32 = vmul.f32 %v3882_v18, %v3881_v29  ;;  %v917_v26 = vrot.slane %v786_v48, 1  ;;  %v1507_v33 = vsel %vm1235_vm8, %v1465_v51, 0.0 }
 0x198   :  { %v912_v42 = vsel %vm327_vm4, %v911_v13, %v910_v23  ;;  %v1481_v59 = vmul.f32 %v3346_v8, %v3346_v8  ;;  %v1338_v17 = vmul.f32 %v2140_v45, %v2140_v45  ;;  %v1354_v12 = vmul.f32 %v3372_v60, %v3372_v60 }
 0x199   :  { %v914_v14 = vsel %vm329_vm5, %v913_v31, %v912_v42  ;;  %1428 = vadd.xlane.f32.xlu1 %v1427_v53  ;;  %v1311_v6 = vsel %vm1235_vm8, %v1228_v32, 0.0  ;;  %v1466_v27 = vmul.f32 %v2141_v0, %v2141_v0  ;;  %v1482_v46 = vmul.f32 %v3388_v25, %v3388_v25  ;;  %v3418_v53 = vld [vmem:[%s3841_s2 + $0xb8] sm:$0x3f] }
 0x19a   :  { %v916_v58 = vsel %vm331_vm6, %v915_v50, %v914_v14  ;;  %v1555_v22 = vsel %vm1235_vm8, %v1481_v59, 0.0  ;;  %v1382_v7 = vsel %vm1235_vm8, %v1338_v17, 0.0  ;;  %v1430_v57 = vsel %vm1235_vm8, %v1354_v12, 0.0  ;;  %v3888_v12 = vld [vmem:[#allocation15_spill] sm:$0xff] }
 0x19b   :  { %v918_v11 = vsel %vm333_vm7, %v917_v26, %v916_v58  ;;  %v3360_v34 = vpop.xlane.xlu0 %1273  ;;  %1288 = vadd.xlane.f32.xlu0 %v1287_v63  ;;  %v1510_v39 = vsel %vm1235_vm8, %v1466_v27, 0.0  ;;  %v1558_v28 = vsel %vm1235_vm8, %v1482_v46, 0.0  ;;  %v1339_v2 = vmul.f32 %v3883_v47, %v3883_v47  ;;  %v3885_v58 = vld [vmem:[#allocation12_spill] sm:$0xff] }
 0x19c   :  { %2007 = vmatprep.mubr.f32.mxu1 %v918_v11  ;;  %v1355_v30 = vmul.f32 %v3403_v16, %v3403_v16  ;;  %v1467_v54 = vmul.f32 %v3884_v61, %v3884_v61  ;;  %v1483_v50 = vmul.f32 %v3418_v53, %v3418_v53 }
 0x19d   :  { %2008 = vmatmul.mubr.f32.gmra.mxu1 %v918_v11  ;;  %1508 = vadd.xlane.f32.xlu1 %v1507_v33  ;;  %v1385_v43 = vsel %vm1235_vm8, %v1339_v2, 0.0  ;;  %v3886_v33 = vld [vmem:[#allocation14_spill] sm:$0xff] }
 0x19e   :  { %v1433_v48 = vsel %vm1235_vm8, %v1355_v30, 0.0  ;;  %v1513_v31 = vsel %vm1235_vm8, %v1467_v54, 0.0  ;;  %v1561_v26 = vsel %vm1235_vm8, %v1483_v50, 0.0  ;;  %v1219_v59 = vmul.f32 %v3886_v33, %v3885_v58 }
 0x19f   :  { %v3374_v19 = vpop.xlane.xlu0 %1279  ;;  %1312 = vadd.xlane.f32.xlu0 %v1311_v6 }
 0x1a0   :  { %v1284_v17 = vsel %vm1235_vm8, %v1219_v59, 0.0 }
 0x1a1   :  { %1556 = vadd.xlane.f32.xlu1 %v1555_v22 }
 0x1a3   :  { %v1369_v10 = vpop.xlane.xlu0 %1368 }
 0x1a4   :  { %v1589_v15 = vmax.f32 %v1369_v10, 1e-16 }
 0x1a5   :  { %1383 = vadd.xlane.f32.xlu1 %v1382_v7  ;;  %v3887_v7 = vld [vmem:[#allocation13_spill] sm:$0xff] }
 0x1a6   :  { %v1227_v10 = vmul.f32 %v3888_v12, %v3887_v7 }
 0x1a7   :  { %v1393_v62 = vpop.xlane.xlu0 %1392 }
 0x1a8   :  { %v1597_v5 = vmax.f32 %v1393_v62, 1e-16  ;;  %v1308_v62 = vsel %vm1235_vm8, %v1227_v10, 0.0 }
 0x1a9   :  { %1431 = vadd.xlane.f32.xlu1 %v1430_v57 }
 0x1ab   :  { %v1417_v49 = vpop.xlane.xlu0 %1416 }
 0x1ac   :  { %v1605_v42 = vmax.f32 %v1417_v49, 1e-16 }
 0x1ad   :  { %1511 = vadd.xlane.f32.xlu1 %v1510_v39 }
 0x1ae   :  { %v3395_v52 = vpop.xlane.xlu1 %1237 }
 0x1af   :  { %v1441_v56 = vpop.xlane.xlu0 %1440 }
 0x1b0   :  { %v1613_v14 = vmax.f32 %v1441_v56, 1e-16 }
 0x1b1   :  { %1559 = vadd.xlane.f32.xlu1 %v1558_v28 }
 0x1b2   :  { %v3405_v24 = vpop.xlane.xlu1 %1240 }
 0x1b3   :  { %v1497_v38 = vpop.xlane.xlu0 %1496 }
 0x1b4   :  { %v1621_v40 = vmax.f32 %v1497_v38, 1e-16 }
 0x1b5   :  { %1386 = vadd.xlane.f32.xlu1 %v1385_v43 }
 0x1b6   :  { %v3410_v20 = vpop.xlane.xlu1 %1246  ;;  %v1653_v13 = vmul.f32 %v1621_v40, %v1589_v15 }
 0x1b7   :  { %v1521_v55 = vpop.xlane.xlu0 %1520 }
 0x1b8   :  { %v1629_v51 = vmax.f32 %v1521_v55, 1e-16  ;;  %2052 = vrsqrt.f32 %v1653_v13 }
 0x1b9   :  { %1434 = vadd.xlane.f32.xlu1 %v1433_v48 }
 0x1ba   :  { %v3420_v23 = vpop.xlane.xlu1 %1252  ;;  %v1661_v63 = vmul.f32 %v1629_v51, %v1597_v5 }
 0x1bb   :  { %v1545_v29 = vpop.xlane.xlu0 %1544 }
 0x1bc   :  { %v1637_v18 = vmax.f32 %v1545_v29, 1e-16  ;;  %2054 = vrsqrt.f32 %v1661_v63 }
 0x1bd   :  { %1514 = vadd.xlane.f32.xlu1 %v1513_v31 }
 0x1be   :  { %v3425_v32 = vpop.xlane.xlu1 %1258  ;;  %v3430_v11 = vmul.f32 %v1637_v18, %v1605_v42 }
 0x1bf   :  { %v1569_v6 = vpop.xlane.xlu0 %1568 }
 0x1c0   :  { %v1645_v22 = vmax.f32 %v1569_v6, 1e-16 }
 0x1c1   :  { %1562 = vadd.xlane.f32.xlu1 %v1561_v26 }
 0x1c2   :  { %v3432_v45 = vpop.xlane.xlu1 %1264  ;;  %v3437_v57 = vmul.f32 %v1645_v22, %v1613_v14 }
 0x1c3   :  { %v1396_v0 = vpop.xlane.xlu0 %1395 }
 0x1c4   :  { %v1598_v49 = vmax.f32 %v1396_v0, 1e-16  ;;  %v821_v0 = vlaneseq }
 0x1c5   :  { %1285 = vadd.xlane.f32.xlu1 %v1284_v17  ;;  %v2053_v63 = vpop.eup %2052 }
 0x1c6   :  { %v3439_v27 = vpop.xlane.xlu1 %1270 }
 0x1c7   :  { %v1444_v39 = vpop.xlane.xlu0 %1443 }
 0x1c8   :  { %v1614_v56 = vmax.f32 %v1444_v39, 1e-16 }
 0x1c9   :  { %1309 = vadd.xlane.f32.xlu1 %v1308_v62 }
 0x1ca   :  { %v3442_v46 = vpop.xlane.xlu1 %1276 }
 0x1cb   :  { %v1524_v28 = vpop.xlane.xlu0 %1523 }
 0x1cc   :  { %v1630_v47 = vmax.f32 %v1524_v28, 1e-16  ;;  %v3448_v28 = vshrl.u32 %v821_v0, 7 }
 0x1ce   :  { %v1366_v2 = vpop.xlane.xlu1 %1365  ;;  %v1662_v43 = vmul.f32 %v1630_v47, %v1598_v49 }
 0x1cf   :  { %v1572_v30 = vpop.xlane.xlu0 %1571  ;;  %v1588_v42 = vmax.f32 %v1366_v2, 1e-16 }
 0x1d0   :  { %v1646_v15 = vmax.f32 %v1572_v30, 1e-16  ;;  %2056 = vrsqrt.f32 %v1662_v43  ;;  %v3452_v43 = vand.u32 127, %v821_v0 }
 0x1d2   :  { %v1390_v38 = vpop.xlane.xlu1 %1389  ;;  %v3444_v40 = vmul.f32 %v1646_v15, %v1614_v56  ;;  %vm1107_vm9 = vcmp.eq.s32.totalorder %v3452_v43, %v3255_v1  ;;  %vm1111_vm11 = vcmp.eq.s32.totalorder %v3452_v43, %v3377_v41  ;;  %vm1109_vm14 = vcmp.eq.s32.totalorder %v3452_v43, %v3362_v9 }
 0x1d3   :  { %v1399_v48 = vpop.xlane.xlu0 %1398  ;;  %v1596_v33 = vmax.f32 %v1390_v38, 1e-16  ;;  %vm1113_vm15 = vcmp.eq.s32.totalorder %v3452_v43, %v3390_v35 }
 0x1d4   :  { %v1599_v55 = vmax.f32 %v1399_v48, 1e-16  ;;  %v3456_v48 = vsub.s32 %v3452_v43, %v3448_v28 }
 0x1d6   :  { %v1414_v61 = vpop.xlane.xlu1 %1413 }
 0x1d7   :  { %v1447_v54 = vpop.xlane.xlu0 %1446  ;;  %v1604_v12 = vmax.f32 %v1414_v61, 1e-16  ;;  %v1717_v61 = vmul.f32 %v2053_v63, %v3405_v24 }
 0x1d8   :  { %v1615_v29 = vmax.f32 %v1447_v54, 1e-16 }
 0x1da   :  { %v1438_v5 = vpop.xlane.xlu1 %1437 }
 0x1db   :  { %v1527_v51 = vpop.xlane.xlu0 %1526  ;;  %v1612_v49 = vmax.f32 %v1438_v5, 1e-16  ;;  %v2055_v5 = vpop.eup %2054 }
 0x1dc   :  { %v1631_v31 = vmax.f32 %v1527_v51, 1e-16 }
 0x1de   :  { %v1494_v50 = vpop.xlane.xlu1 %1493  ;;  %v1663_v18 = vmul.f32 %v1631_v31, %v1599_v55 }
 0x1df   :  { %v1620_v14 = vmax.f32 %v1494_v50, 1e-16  ;;  %v1575_v26 = vpop.xlane.xlu0 %1574 }
 0x1e0   :  { %v1647_v58 = vmax.f32 %v1575_v26, 1e-16 }
 0x1e1   :  { %v1652_v59 = vmul.f32 %v1620_v14, %v1588_v42  ;;  %v2057_v42 = vpop.eup %2056 }
 0x1e2   :  { %v1518_v6 = vpop.xlane.xlu1 %1517  ;;  %v3446_v22 = vmul.f32 %v1647_v58, %v1615_v29  ;;  %v1787_v58 = vrot.slane %v1717_v61, %v3456_v48  ;;  %v1726_v24 = vmul.f32 %v2057_v42, %v3348_v3 }
 0x1e3   :  { %2058 = vrsqrt.f32 %v1652_v59  ;;  %v1628_v17 = vmax.f32 %v1518_v6, 1e-16  ;;  %v1402_v7 = vpop.xlane.xlu0 %1401 }
 0x1e4   :  { %2060 = vrsqrt.f32 %v1663_v18  ;;  %v1600_v56 = vmax.f32 %v1402_v7, 1e-16 }
 0x1e5   :  { %v1660_v10 = vmul.f32 %v1628_v17, %v1596_v33  ;;  %v1725_v33 = vmul.f32 %v2055_v5, %v3432_v45  ;;  %v1823_v45 = vrot.slane %v1726_v24, %v3456_v48 }
 0x1e6   :  { %v1542_v13 = vpop.xlane.xlu1 %1541 }
 0x1e7   :  { %2062 = vrsqrt.f32 %v1660_v10  ;;  %v1636_v62 = vmax.f32 %v1542_v13, 1e-16  ;;  %v1450_v39 = vpop.xlane.xlu0 %1449  ;;  %v1819_v0 = vrot.slane %v1725_v33, %v3456_v48 }
 0x1e8   :  { %v1616_v51 = vmax.f32 %v1450_v39, 1e-16 }
 0x1e9   :  { %v3450_v47 = vmul.f32 %v1636_v62, %v1604_v12 }
 0x1ea   :  { %v1566_v2 = vpop.xlane.xlu1 %1565 }
 0x1eb   :  { %v1644_v30 = vmax.f32 %v1566_v2, 1e-16  ;;  %v1530_v15 = vpop.xlane.xlu0 %1529 }
 0x1ec   :  { %v1632_v38 = vmax.f32 %v1530_v15, 1e-16 }
 0x1ed   :  { %v3459_v54 = vmul.f32 %v1644_v30, %v1612_v49 }
 0x1ee   :  { %v1372_v55 = vpop.xlane.xlu1 %1371  ;;  %v1664_v31 = vmul.f32 %v1632_v38, %v1600_v56 }
 0x1ef   :  { %v1578_v50 = vpop.xlane.xlu0 %1577 }
 0x1f0   :  { %v2059_v29 = vpop.eup %2058  ;;  %2064 = vrsqrt.f32 %v1664_v31  ;;  %v1648_v18 = vmax.f32 %v1578_v50, 1e-16 }
 0x1f1   :  { %v2061_v14 = vpop.eup %2060  ;;  %v1716_v26 = vmul.f32 %v2059_v29, %v3395_v52  ;;  %v1590_v52 = vmax.f32 %v1372_v55, 1e-16 }
 0x1f2   :  { %v1420_v59 = vpop.xlane.xlu1 %1419  ;;  %v3465_v6 = vmul.f32 %v1648_v18, %v1616_v51  ;;  %v1727_v10 = vmul.f32 %v2061_v14, %v3439_v27 }
 0x1f3   :  { %v1783_v17 = vrot.slane %v1716_v26, %v3456_v48  ;;  %v1405_v7 = vpop.xlane.xlu0 %1404  ;;  %v1606_v56 = vmax.f32 %v1420_v59, 1e-16 }
 0x1f4   :  { %v2063_v12 = vpop.eup %2062  ;;  %v1827_v2 = vrot.slane %v1727_v10, %v3456_v48 }
 0x1f5   :  { %v1724_v13 = vmul.f32 %v2063_v12, %v3329_v44  ;;  %v1908_v62 = vsel %vm321_vm1, %v1787_v58, %v1783_v17  ;;  %v1601_v44 = vmax.f32 %v1405_v7, 1e-16 }
 0x1f6   :  { %v1500_v39 = vpop.xlane.xlu1 %1499 }
 0x1f7   :  { %v1815_v3 = vrot.slane %v1724_v13, %v3456_v48  ;;  %v1622_v49 = vmax.f32 %v1500_v39, 1e-16  ;;  %v1453_v63 = vpop.xlane.xlu0 %1452 }
 0x1f8   :  { %v1617_v29 = vmax.f32 %v1453_v63, 1e-16 }
 0x1f9   :  { %v1654_v30 = vmul.f32 %v1622_v49, %v1590_v52  ;;  %v1915_v27 = vsel %vm321_vm1, %v1819_v0, %v1815_v3 }
 0x1fa   :  { %v1548_v15 = vpop.xlane.xlu1 %1547  ;;  %v1916_v38 = vsel %vm323_vm2, %v1823_v45, %v1915_v27 }
 0x1fb   :  { %2066 = vrsqrt.f32 %v1654_v30  ;;  %v1638_v61 = vmax.f32 %v1548_v15, 1e-16  ;;  %v1533_v5 = vpop.xlane.xlu0 %1532  ;;  %v1917_v51 = vsel %vm325_vm3, %v1827_v2, %v1916_v38 }
 0x1fc   :  { %v1633_v55 = vmax.f32 %v1533_v5, 1e-16 }
 0x1fd   :  { %v2065_v31 = vpop.eup %2064  ;;  %v3478_v42 = vmul.f32 %v1638_v61, %v1606_v56 }
 0x1fe   :  { %v1375_v50 = vpop.xlane.xlu1 %1374  ;;  %v1665_v18 = vmul.f32 %v1633_v55, %v1601_v44  ;;  %v1728_v14 = vmul.f32 %v2065_v31, %v3360_v34 }
 0x1ff   :  { %v1581_v26 = vpop.xlane.xlu0 %1580  ;;  %v1591_v12 = vmax.f32 %v1375_v50, 1e-16 }
 0x200   :  { %2068 = vrsqrt.f32 %v1665_v18  ;;  %v1649_v58 = vmax.f32 %v1581_v26, 1e-16  ;;  %v1831_v33 = vrot.slane %v1728_v14, %v3456_v48 }
 0x202   :  { %v1423_v59 = vpop.xlane.xlu1 %1422  ;;  %v3482_v24 = vmul.f32 %v1649_v58, %v1617_v29  ;;  %v1918_v17 = vsel %vm327_vm4, %v1831_v33, %v1917_v51 }
 0x203   :  { %v1408_v7 = vpop.xlane.xlu0 %1407  ;;  %v1607_v45 = vmax.f32 %v1423_v59, 1e-16 }
 0x204   :  { %v1602_v49 = vmax.f32 %v1408_v7, 1e-16 }
 0x206   :  { %v1503_v10 = vpop.xlane.xlu1 %1502 }
 0x207   :  { %v1623_v13 = vmax.f32 %v1503_v10, 1e-16  ;;  %v1456_v0 = vpop.xlane.xlu0 %1455 }
 0x208   :  { %v2067_v52 = vpop.eup %2066  ;;  %v1618_v61 = vmax.f32 %v1456_v0, 1e-16 }
 0x209   :  { %v1718_v39 = vmul.f32 %v2067_v52, %v3280_v21  ;;  %v1655_v34 = vmul.f32 %v1623_v13, %v1591_v12 }
 0x20a   :  { %v1551_v3 = vpop.xlane.xlu1 %1550 }
 0x20b   :  { %2070 = vrsqrt.f32 %v1655_v34  ;;  %v1639_v63 = vmax.f32 %v1551_v3, 1e-16  ;;  %v1536_v2 = vpop.xlane.xlu0 %1535  ;;  %v1791_v56 = vrot.slane %v1718_v39, %v3456_v48 }
 0x20c   :  { %v1634_v30 = vmax.f32 %v1536_v2, 1e-16 }
 0x20d   :  { %v2069_v27 = vpop.eup %2068  ;;  %v3487_v15 = vmul.f32 %v1639_v63, %v1607_v45  ;;  %v1909_v44 = vsel %vm323_vm2, %v1791_v56, %v1908_v62 }
 0x20e   :  { %v1378_v38 = vpop.xlane.xlu1 %1377  ;;  %v1666_v5 = vmul.f32 %v1634_v30, %v1602_v49  ;;  %v1729_v21 = vmul.f32 %v2069_v27, %v3442_v46 }
 0x20f   :  { %v1584_v55 = vpop.xlane.xlu0 %1583  ;;  %v1592_v26 = vmax.f32 %v1378_v38, 1e-16 }
 0x210   :  { %2072 = vrsqrt.f32 %v1666_v5  ;;  %v1650_v51 = vmax.f32 %v1584_v55, 1e-16  ;;  %v1835_v31 = vrot.slane %v1729_v21, %v3456_v48 }
 0x211   :  { %2074 = vrsqrt.f32 %v3430_v11 }
 0x212   :  { %v1426_v50 = vpop.xlane.xlu1 %1425  ;;  %v3492_v29 = vmul.f32 %v1650_v51, %v1618_v61  ;;  %v1919_v18 = vsel %vm329_vm5, %v1835_v31, %v1918_v17 }
 0x213   :  { %v1411_v14 = vpop.xlane.xlu0 %1410  ;;  %v1608_v7 = vmax.f32 %v1426_v50, 1e-16 }
 0x214   :  { %v1603_v0 = vmax.f32 %v1411_v14, 1e-16 }
 0x216   :  { %v1506_v62 = vpop.xlane.xlu1 %1505 }
 0x217   :  { %v1624_v58 = vmax.f32 %v1506_v62, 1e-16  ;;  %v1459_v33 = vpop.xlane.xlu0 %1458  ;;  %v823_v62 = vsub.s32 0, %v3448_v28 }
 0x218   :  { %v2071_v59 = vpop.eup %2070 }
 0x219   :  { %v1719_v46 = vmul.f32 %v2071_v59, %v3410_v20  ;;  %v1656_v12 = vmul.f32 %v1624_v58, %v1592_v26  ;;  %v1619_v20 = vmax.f32 %v1459_v33, 1e-16 }
 0x21a   :  { %v1554_v10 = vpop.xlane.xlu1 %1553 }
 0x21b   :  { %2076 = vrsqrt.f32 %v1656_v12  ;;  %v1640_v13 = vmax.f32 %v1554_v10, 1e-16  ;;  %v1795_v52 = vrot.slane %v1719_v46, %v3456_v48  ;;  %v827_v46 = vsub.s32 1, %v3448_v28 }
 0x21c   :  { %v1539_v39 = vpop.xlane.xlu0 %1538  ;;  %2078 = vrsqrt.f32 %v3437_v57 }
 0x21d   :  { %v2073_v17 = vpop.eup %2072  ;;  %v3498_v45 = vmul.f32 %v1640_v13, %v1608_v7  ;;  %v1635_v11 = vmax.f32 %v1539_v39, 1e-16  ;;  %v1910_v34 = vsel %vm325_vm3, %v1795_v52, %v1909_v44  ;;  %v1013_v39 = vld [vmem:[%s3845_s5 + $0x8] sm:$0xff]  ;;  %2080 = vrsqrt.f32 %v3450_v47 }
 0x21e   :  { %v3501_v3 = vpop.xlane.xlu1 %1380  ;;  %v1730_v49 = vmul.f32 %v2073_v17, %v3374_v19  ;;  %v2075_v27 = vpop.eup %2074  ;;  %v3542_v17 = vadd.s32 128, %v3452_v43  ;;  %2082 = vrsqrt.f32 %v3459_v54  ;;  %v2147_v43 = vld [vmem:[%s3841_s2 + $0xe0] sm:$0x3f] }
 0x21f   :  { %v3504_v63 = vmul.f32 %v1635_v11, %v1603_v0  ;;  %v1012_v0 = vld [vmem:[%s3845_s5] sm:$0xff] }
 0x220   :  { %v1587_v2 = vpop.xlane.xlu0 %1586  ;;  %v1839_v56 = vrot.slane %v1730_v49, %v3456_v48  ;;  %vm1108_vm10 = vcmp.eq.s32.totalorder %v3542_v17, %v3255_v1  ;;  %vm1112_vm12 = vcmp.eq.s32.totalorder %v3542_v17, %v3377_v41  ;;  %vm1110_vm13 = vcmp.eq.s32.totalorder %v3542_v17, %v3362_v9  ;;  %v1015_v9 = vld [vmem:[%s3845_s5 + $0x18] sm:$0xff] }
 0x221   :  { %v1651_v30 = vmax.f32 %v1587_v2, 1e-16  ;;  %vm1114_vm0 = vcmp.eq.s32.totalorder %v3542_v17, %v3390_v35  ;;  %v2146_v35 = vld [vmem:[%s3840_s1 + $0xe0] sm:$0x3f] }
 0x222   :  { %v1429_v38 = vpop.xlane.xlu1 %1428  ;;  %v3508_v61 = vsel %vm331_vm6, %v1839_v56, %v1919_v18  ;;  %v819_v18 = vld [vmem:[%s3844_s4] sm:$0x3]  ;;  %v1231_v17 = vmul.f32 %v2147_v43, %v2146_v35 }
 0x223   :  { %v3510_v5 = vmul.f32 %v1651_v30, %v1619_v20  ;;  %v1609_v51 = vmax.f32 %v1429_v38, 1e-16  ;;  %v3532_v12 = vrot.slane %v819_v18, %v827_v46  ;;  %v2156_v35 = vld [vmem:[%s3840_s1 + $0xa0] sm:$0x3f] }
 0x224   :  { %v1289_v21 = vpop.xlane.xlu0 %1288  ;;  %v2157_v43 = vld [vmem:[%s3841_s2 + $0xa0] sm:$0x3f] }
 0x225   :  { %v3512_v44 = vmul.f32 %v2075_v27, %v1289_v21 }
 0x226   :  { %v3514_v55 = vpop.xlane.xlu1 %1508 }
 0x228   :  { %v2077_v19 = vpop.eup %2076  ;;  %v1313_v46 = vpop.xlane.xlu0 %1312 }
 0x229   :  { %v1720_v31 = vmul.f32 %v2077_v19, %v3285_v36  ;;  %v3530_v36 = vrot.slane %v819_v18, %v823_v62 }
 0x22a   :  { %v1557_v50 = vpop.xlane.xlu1 %1556 }
 0x22b   :  { %v1641_v14 = vmax.f32 %v1557_v50, 1e-16  ;;  %v1799_v26 = vrot.slane %v1720_v31, %v3456_v48 }
 0x22d   :  { %v3519_v58 = vmul.f32 %v1641_v14, %v1609_v51  ;;  %v3525_v33 = vsel %vm327_vm4, %v1799_v26, %v1910_v34  ;;  %v2079_v26 = vpop.eup %2078 }
 0x22e   :  { %v3527_v59 = vpop.xlane.xlu1 %1383  ;;  %v2081_v18 = vpop.eup %2080  ;;  %v1741_v47 = vmul.f32 %v2079_v26, %v1313_v46 }
 0x232   :  { %v1432_v7 = vpop.xlane.xlu1 %1431 }
 0x233   :  { %v989_v10 = vpop.f32.mrf.mxu0  ;;  %v1610_v56 = vmax.f32 %v1432_v7, 1e-16 }
 0x234   :  { %v990_v13 = vadd.f32 %v989_v10, %v3530_v36 }
 0x235   :  { %v991_v52 = vpop.f32.mrf.mxu0 }
 0x236   :  { %v3544_v28 = vpop.xlane.xlu1 %1511  ;;  %v992_v11 = vadd.f32 %v991_v52, %v3532_v12  ;;  %v3551_v34 = vadd.f32 %v1012_v0, %v990_v13  ;;  %v1115_v49 = vsel %vm1107_vm9, %v990_v13, 0.0  ;;  %v1851_v0 = vrot.slane %v3512_v44, %v3456_v48  ;;  %v2083_v52 = vpop.eup %2082 }
 0x238   :  { %v3553_v20 = vadd.f32 %v1013_v39, %v992_v11  ;;  %v1116_v2 = vsel %vm1108_vm10, %v992_v11, 0.0 }
 0x239   :  { %v1123_v30 = vadd.f32 %v1116_v2, %v1115_v49  ;;  %v1016_v2 = vld [vmem:[%s3845_s5 + $0x20] sm:$0xff] }
 0x23a   :  { %v1560_v27 = vpop.xlane.xlu1 %1559  ;;  %v1028_v38 = vmax.f32 %v3551_v34, %v3553_v20 }
 0x23b   :  { %v1642_v21 = vmax.f32 %v1560_v27, 1e-16  ;;  %1124 = vadd.xlane.f32.xlu1 %v1123_v30 }
 0x23c   :  { %1029 = vmax.xlane.f32.xlu0 %v1028_v38  ;;  %v1883_v38 = vrot.slane %v1741_v47, %v3456_v48 }
 0x23d   :  { %v3557_v19 = vmul.f32 %v1642_v21, %v1610_v56  ;;  %v1017_v21 = vld [vmem:[%s3845_s5 + $0x28] sm:$0xff] }
 0x23e   :  { %v3560_v1 = vpop.xlane.xlu1 %1386 }
 0x23f   :  { %v995_v13 = vpop.f32.mrf.mxu0 }
 0x241   :  { %v997_v56 = vpop.f32.mrf.mxu0 }
 0x242   :  { %v1435_v51 = vpop.xlane.xlu1 %1434  ;;  %v998_v26 = vadd.f32 %v997_v56, %v3532_v12 }
 0x243   :  { %v1611_v50 = vmax.f32 %v1435_v51, 1e-16 }
 0x246   :  { %v3564_v31 = vpop.xlane.xlu1 %1514 }
 0x24a   :  { %v1563_v14 = vpop.xlane.xlu1 %1562 }
 0x24b   :  { %v1643_v62 = vmax.f32 %v1563_v14, 1e-16 }
 0x24d   :  { %v3566_v7 = vmul.f32 %v1643_v62, %v1611_v50 }
 0x24e   :  { %v1286_v10 = vpop.xlane.xlu1 %1285 }
 0x24f   :  { %v1732_v57 = vmul.f32 %v2081_v18, %v1286_v10 }
 0x251   :  { %v1847_v54 = vrot.slane %v1732_v57, %v3456_v48  ;;  %v996_v57 = vadd.f32 %v995_v13, %v3530_v36  ;;  %v2143_v13 = vld [vmem:[%s3841_s2 + $0xd0] sm:$0x3f] }
 0x252   :  { %v1001_v39 = vpop.f32.mrf.mxu1  ;;  %v1310_v11 = vpop.xlane.xlu1 %1309 }
 0x253   :  { %v1002_v49 = vadd.f32 %v1001_v39, %v3530_v36  ;;  %v3576_v30 = vsel %vm321_vm1, %v1851_v0, %v1847_v54  ;;  %v1740_v27 = vmul.f32 %v2083_v52, %v1310_v11  ;;  %v1118_v52 = vsel %vm1110_vm13, %v998_v26, 0.0  ;;  %v2142_v54 = vld [vmem:[%s3840_s1 + $0xd0] sm:$0x3f] }
 0x254   :  { %v1003_v44 = vpop.f32.mrf.mxu1  ;;  %v1117_v41 = vsel %vm1109_vm14, %v996_v57, 0.0  ;;  %v1229_v39 = vmul.f32 %v2143_v13, %v2142_v54  ;;  %v1320_v13 = vsel %vm1235_vm8, %v1231_v17, 0.0  ;;  %v1223_v17 = vmul.f32 %v2157_v43, %v2156_v35 }
 0x255   :  { %v1004_v51 = vadd.f32 %v1003_v44, %v3532_v12  ;;  %v1879_v50 = vrot.slane %v1740_v27, %v3456_v48  ;;  %v3584_v14 = vadd.f32 %v1016_v2, %v1002_v49  ;;  %v1119_v62 = vsel %vm1111_vm11, %v1002_v49, 0.0  ;;  %v2144_v44 = vld [vmem:[%s3840_s1 + $0xd8] sm:$0x3f] }
 0x256   :  { %v1126_v49 = vadd.f32 %v1118_v52, %v1117_v41 }
 0x257   :  { %v3591_v18 = vadd.f32 %v1017_v21, %v1004_v51  ;;  %v1120_v46 = vsel %vm1112_vm12, %v1004_v51, 0.0  ;;  %v3594_v10 = vsel %vm321_vm1, %v1883_v38, %v1879_v50  ;;  %v1314_v38 = vsel %vm1235_vm8, %v1229_v39, 0.0  ;;  %v2145_v21 = vld [vmem:[%s3841_s2 + $0xd8] sm:$0x3f]  ;;  %v2148_v39 = vld [vmem:[%s3840_s1 + $0xe8] sm:$0x3f] }
 0x258   :  { %v1129_v0 = vadd.f32 %v1120_v46, %v1119_v62  ;;  %v1230_v51 = vmul.f32 %v2145_v21, %v2144_v44  ;;  %v3628_v62 = vadd.f32 %v1015_v9, %v998_v26  ;;  %v1018_v26 = vld [vmem:[%s3845_s5 + $0x30] sm:$0xff]  ;;  %vm1940_vm1 = vcmask 48128  }
 0x259   :  { %v1034_v47 = vmax.f32 %v3584_v14, %v3591_v18  ;;  %v2151_v9 = vld [vmem:[%s3841_s2 + $0x90] sm:$0x3f] }
 0x25a   :  { %1130 = vadd.xlane.f32.xlu1 %v1129_v0  ;;  %v1019_v0 = vld [vmem:[%s3845_s5 + $0x38] sm:$0xff]  ;;  %v2153_v21 = vld [vmem:[%s3841_s2 + $0xf0] sm:$0x3f] }
 0x25b   :  { %1035 = vmax.xlane.f32.xlu0 %v1034_v47  ;;  %v1317_v47 = vsel %vm1235_vm8, %v1230_v51, 0.0 }
 0x25d   :  { %v1007_v11 = vpop.f32.mrf.mxu1 }
 0x25e   :  { %v1008_v2 = vadd.f32 %v1007_v11, %v3530_v36  ;;  %v1014_v36 = vld [vmem:[%s3845_s5 + $0x10] sm:$0xff] }
 0x25f   :  { %v1009_v56 = vpop.f32.mrf.mxu1  ;;  %1127 = vadd.xlane.f32.xlu0 %v1126_v49  ;;  %v3640_v52 = vadd.f32 %v1014_v36, %v996_v57  ;;  %v2149_v57 = vld [vmem:[%s3841_s2 + $0xe8] sm:$0x3f] }
 0x260   :  { %v1010_v27 = vadd.f32 %v1009_v56, %v3532_v12  ;;  %v1121_v12 = vsel %vm1113_vm15, %v1008_v2, 0.0  ;;  %v1232_v11 = vmul.f32 %v2149_v57, %v2148_v39  ;;  %v3656_v49 = vadd.f32 %v1018_v26, %v1008_v2  ;;  %v2150_v56 = vld [vmem:[%s3840_s1 + $0x90] sm:$0x3f] }
 0x261   :  { %v1031_v54 = vmax.f32 %v3640_v52, %v3628_v62  ;;  %v2152_v2 = vld [vmem:[%s3840_s1 + $0xf0] sm:$0x3f]  ;;  %v1296_v26 = vsel %vm1235_vm8, %v1223_v17, 0.0  ;;  %v1225_v39 = vmul.f32 %v3388_v25, %v3372_v60 }
 0x262   :  { %v1122_v50 = vsel %vm1114_vm0, %v1010_v27, 0.0  ;;  %v3645_v41 = vadd.f32 %v1019_v0, %v1010_v27  ;;  %v1221_v27 = vmul.f32 %v2151_v9, %v2150_v56  ;;  %v1323_v44 = vsel %vm1235_vm8, %v1232_v11, 0.0  ;;  %v2158_v11 = vld [vmem:[%s3840_s1 + $0x78] sm:$0x3f] }
 0x263   :  { %v1132_v46 = vadd.f32 %v1122_v50, %v1121_v12  ;;  %1315 = vadd.xlane.f32.xlu0 %v1314_v38  ;;  %v1233_v51 = vmul.f32 %v2153_v21, %v2152_v2  ;;  %v2154_v12 = vld [vmem:[%s3840_s1 + $0x98] sm:$0x3f]  ;;  %v1302_v57 = vsel %vm1235_vm8, %v1225_v39, 0.0 }
 0x264   :  { %v1037_v38 = vmax.f32 %v3656_v49, %v3645_v41  ;;  %v1290_v36 = vsel %vm1235_vm8, %v1221_v27, 0.0  ;;  %v2155_v50 = vld [vmem:[%s3841_s2 + $0x98] sm:$0x3f] }
 0x265   :  { %1133 = vadd.xlane.f32.xlu1 %v1132_v46  ;;  %v1222_v46 = vmul.f32 %v2155_v50, %v2154_v12  ;;  %v1326_v0 = vsel %vm1235_vm8, %v1233_v51, 0.0  ;;  %v2159_v56 = vld [vmem:[%s3841_s2 + $0x78] sm:$0x3f]  ;;  %v1593_v51 = vmax.f32 %v3501_v3, 1e-16 }
 0x266   :  { %v1218_v9 = vmul.f32 %v2159_v56, %v2158_v11  ;;  %v1594_v12 = vmax.f32 %v3527_v59, 1e-16  ;;  %v1626_v50 = vmax.f32 %v3544_v28, 1e-16 }
 0x267   :  { %1318 = vadd.xlane.f32.xlu0 %v1317_v47  ;;  %v1293_v47 = vsel %vm1235_vm8, %v1222_v46, 0.0 }
 0x269   :  { %1032 = vmax.xlane.f32.xlu1 %v1031_v54  ;;  %v1224_v54 = vmul.f32 %v3346_v8, %v3308_v4  ;;  %v1281_v4 = vsel %vm1235_vm8, %v1218_v9, 0.0 }
 0x26b   :  { %1321 = vadd.xlane.f32.xlu0 %v1320_v13  ;;  %v1299_v13 = vsel %vm1235_vm8, %v1224_v54, 0.0 }
 0x26d   :  { %1038 = vmax.xlane.f32.xlu1 %v1037_v38 }
 0x26f   :  { %1324 = vadd.xlane.f32.xlu0 %v1323_v44 }
 0x271   :  { %1291 = vadd.xlane.f32.xlu1 %v1290_v36  ;;  %v1625_v36 = vmax.f32 %v3514_v55, 1e-16 }
 0x273   :  { %1327 = vadd.xlane.f32.xlu0 %v1326_v0  ;;  %v1657_v46 = vmul.f32 %v1625_v36, %v1593_v51  ;;  %v1658_v0 = vmul.f32 %v1626_v50, %v1594_v12 }
 0x275   :  { %1294 = vadd.xlane.f32.xlu1 %v1293_v47 }
 0x279   :  { %1297 = vadd.xlane.f32.xlu1 %v1296_v26 }
 0x27d   :  { %1300 = vadd.xlane.f32.xlu1 %v1299_v13 }
 0x281   :  { %1303 = vadd.xlane.f32.xlu1 %v1302_v57 }
 0x285   :  { %1282 = vadd.xlane.f32.xlu1 %v1281_v4 }
 0x2c4   :  { %v3716_v35 = vpop.xlane.xlu1 %1124 }
 0x2c5   :  { %v3702_v8 = vpop.xlane.xlu0 %1029 }
 0x2c6   :  { %v1040_v60 = vsub.f32 %v3551_v34, %v3702_v8  ;;  %v1041_v25 = vsub.f32 %v3553_v20, %v3702_v8  ;;  %v1595_v34 = vmax.f32 %v3560_v1, 1e-16  ;;  %v1627_v20 = vmax.f32 %v3564_v31, 1e-16 }
 0x2c8   :  { %v1048_v27 = vmul.f32 1.442695, %v1040_v60  ;;  %v1050_v38 = vmul.f32 1.442695, %v1041_v25  ;;  %v1659_v47 = vmul.f32 %v1627_v20, %v1595_v34 }
 0x2ca   :  { %2084 = vpow2.f32 %v1048_v27 }
 0x2cb   :  { %2086 = vpow2.f32 %v1050_v38 }
 0x2cc   :  { %2088 = vrsqrt.f32 %v3444_v40 }
 0x2cd   :  { %2090 = vrsqrt.f32 %v3446_v22 }
 0x2ce   :  { %2092 = vrsqrt.f32 %v1657_v46 }
 0x2cf   :  { %2094 = vrsqrt.f32 %v1658_v0 }
 0x2d0   :  { %2096 = vrsqrt.f32 %v1659_v47 }
 0x2d1   :  { %2098 = vrsqrt.f32 %v3465_v6 }
 0x2d7   :  { %v2085_v44 = vpop.eup %2084 }
 0x2d8   :  { %v2087_v2 = vpop.eup %2086 }
 0x2d9   :  { %v1064_v21 = vadd.f32 %v2087_v2, %v2085_v44  ;;  %v2089_v31 = vpop.eup %2088 }
 0x2db   :  { %1065 = vadd.xlane.f32.xlu0 %v1064_v21 }
 0x2e3   :  { %v3725_v1 = vpop.xlane.xlu1 %1130 }
 0x2e4   :  { %v3718_v3 = vpop.xlane.xlu0 %1035 }
 0x2e5   :  { %v1044_v55 = vsub.f32 %v3584_v14, %v3718_v3  ;;  %v1045_v59 = vsub.f32 %v3591_v18, %v3718_v3  ;;  %v2091_v18 = vpop.eup %2090 }
 0x2e6   :  { %v2093_v26 = vpop.eup %2092 }
 0x2e7   :  { %v1056_v40 = vmul.f32 1.442695, %v1044_v55  ;;  %v1058_v28 = vmul.f32 1.442695, %v1045_v59  ;;  %v2095_v13 = vpop.eup %2094 }
 0x2e8   :  { %v3727_v22 = vpop.xlane.xlu0 %1127 }
 0x2e9   :  { %2100 = vpow2.f32 %v1056_v40 }
 0x2ea   :  { %2102 = vpow2.f32 %v1058_v28 }
 0x2eb   :  { %2104 = vrsqrt.f32 %v3482_v24 }
 0x2ec   :  { %v1316_v43 = vpop.xlane.xlu0 %1315  ;;  %2106 = vrsqrt.f32 %v3478_v42  ;;  %v2097_v42 = vpop.eup %2096 }
 0x2ed   :  { %v1742_v14 = vmul.f32 %v2089_v31, %v1316_v43  ;;  %2108 = vrsqrt.f32 %v3492_v29  ;;  %v2099_v9 = vpop.eup %2098 }
 0x2ee   :  { %v3731_v17 = vpop.xlane.xlu1 %1133  ;;  %2110 = vrsqrt.f32 %v3487_v15  ;;  %v1721_v15 = vmul.f32 %v2093_v26, %v3420_v23 }
 0x2ef   :  { %v1887_v6 = vrot.slane %v1742_v14, %v3456_v48  ;;  %2112 = vrsqrt.f32 %v3498_v45  ;;  %v1723_v45 = vmul.f32 %v2097_v42, %v3425_v32 }
 0x2f0   :  { %v1319_v54 = vpop.xlane.xlu0 %1318  ;;  %2114 = vrsqrt.f32 %v3519_v58  ;;  %v1803_v12 = vrot.slane %v1721_v15, %v3456_v48 }
 0x2f1   :  { %v1930_v24 = vsel %vm323_vm2, %v1887_v6, %v3594_v10  ;;  %v1743_v39 = vmul.f32 %v2091_v18, %v1319_v54  ;;  %v1722_v10 = vmul.f32 %v2095_v13, %v3310_v37 }
 0x2f2   :  { %v3738_v57 = vpop.xlane.xlu1 %1032  ;;  %v1912_v40 = vsel %vm329_vm5, %v1803_v12, %v3525_v33 }
 0x2f3   :  { %v1042_v11 = vsub.f32 %v3640_v52, %v3738_v57  ;;  %v1043_v29 = vsub.f32 %v3628_v62, %v3738_v57  ;;  %v1891_v56 = vrot.slane %v1743_v39, %v3456_v48  ;;  %v1226_v62 = vmul.f32 %v3418_v53, %v3403_v16 }
 0x2f4   :  { %v1322_v4 = vpop.xlane.xlu0 %1321  ;;  %v1807_v16 = vrot.slane %v1722_v10, %v3456_v48 }
 0x2f5   :  { %v1052_v60 = vmul.f32 1.442695, %v1042_v11  ;;  %v1054_v25 = vmul.f32 1.442695, %v1043_v29  ;;  %v1931_v27 = vsel %vm325_vm3, %v1891_v56, %v1930_v24  ;;  %v1744_v38 = vmul.f32 %v2099_v9, %v1322_v4 }
 0x2f6   :  { %v2101_v44 = vpop.eup %2100  ;;  %v3750_v52 = vpop.xlane.xlu1 %1038  ;;  %v1305_v47 = vsel %vm1235_vm8, %v1226_v62, 0.0  ;;  %v1913_v43 = vsel %vm331_vm6, %v1807_v16, %v1912_v40 }
 0x2f7   :  { %v2103_v2 = vpop.eup %2102  ;;  %2116 = vpow2.f32 %v1052_v60  ;;  %v1046_v37 = vsub.f32 %v3656_v49, %v3750_v52  ;;  %v1047_v23 = vsub.f32 %v3645_v41, %v3750_v52  ;;  %v1895_v21 = vrot.slane %v1744_v38, %v3456_v48 }
 0x2f8   :  { %v2105_v51 = vpop.eup %2104  ;;  %2118 = vpow2.f32 %v1054_v25  ;;  %v1325_v58 = vpop.xlane.xlu0 %1324  ;;  %v1070_v36 = vadd.f32 %v2103_v2, %v2101_v44  ;;  %v1811_v41 = vrot.slane %v1723_v45, %v3456_v48  ;;  %v2160_v45 = vld [vmem:[%s3840_s1 + $0xf8] sm:$0x3f] }
 0x2f9   :  { %v1060_v53 = vmul.f32 1.442695, %v1046_v37  ;;  %v1062_v32 = vmul.f32 1.442695, %v1047_v23  ;;  %v1932_v50 = vsel %vm327_vm4, %v1895_v21, %v1931_v27  ;;  %v1745_v34 = vmul.f32 %v2105_v51, %v1325_v58  ;;  %v2107_v20 = vpop.eup %2106  ;;  %v2161_v2 = vld [vmem:[%s3841_s2 + $0xf8] sm:$0x3f] }
 0x2fa   :  { %2120 = vrsqrt.f32 %v3557_v19  ;;  %v1292_v49 = vpop.xlane.xlu1 %1291  ;;  %1071 = vadd.xlane.f32.xlu0 %v1070_v36  ;;  %v2109_v55 = vpop.eup %2108  ;;  %v1914_v6 = vsel %vm333_vm7, %v1811_v41, %v1913_v43  ;;  %v1234_v37 = vmul.f32 %v2161_v2, %v2160_v45 }
 0x2fb   :  { %2122 = vpow2.f32 %v1060_v53  ;;  %v1734_v46 = vmul.f32 %v2107_v20, %v1292_v49  ;;  %v1899_v0 = vrot.slane %v1745_v34, %v3456_v48  ;;  %v2111_v14 = vpop.eup %2110  ;;  %v1941_v39 = vsel %vm1940_vm1, %v1914_v6, 0.0 }
 0x2fc   :  { %2124 = vpow2.f32 %v1062_v32  ;;  %v1328_v59 = vpop.xlane.xlu0 %1327  ;;  %v2113_v33 = vpop.eup %2112  ;;  %v1329_v12 = vsel %vm1235_vm8, %v1234_v37, 0.0 }
 0x2fd   :  { %v1855_v28 = vrot.slane %v1734_v46, %v3456_v48  ;;  %v1933_v19 = vsel %vm329_vm5, %v1899_v0, %v1932_v50  ;;  %v1746_v31 = vmul.f32 %v2109_v55, %v1328_v59  ;;  %2126 = vrsqrt.f32 %v3504_v63  ;;  %v2115_v29 = vpop.eup %2114 }
 0x2fe   :  { %v1295_v18 = vpop.xlane.xlu1 %1294  ;;  %1306 = vadd.xlane.f32.xlu0 %v1305_v47 }
 0x2ff   :  { %v1923_v26 = vsel %vm323_vm2, %v1855_v28, %v3576_v30  ;;  %v1735_v54 = vmul.f32 %v2111_v14, %v1295_v18  ;;  %v1903_v13 = vrot.slane %v1746_v31, %v3456_v48  ;;  %vm1953_vm2 = vcmask 7168  }
 0x301   :  { %v1859_v24 = vrot.slane %v1735_v54, %v3456_v48  ;;  %v3780_v42 = vsel %vm331_vm6, %v1903_v13, %v1933_v19 }
 0x302   :  { %v1298_v11 = vpop.xlane.xlu1 %1297  ;;  %1942 = vadd.xlane.f32.xlu0 %v1941_v39 }
 0x303   :  { %v1924_v56 = vsel %vm325_vm3, %v1859_v24, %v1923_v26  ;;  %v1736_v9 = vmul.f32 %v2113_v33, %v1298_v11  ;;  %vm1958_vm3 = vcmask 15360  }
 0x304   :  { %v2117_v30 = vpop.eup %2116 }
 0x305   :  { %v2119_v4 = vpop.eup %2118  ;;  %v1863_v15 = vrot.slane %v1736_v9, %v3456_v48 }
 0x306   :  { %v1301_v10 = vpop.xlane.xlu1 %1300  ;;  %v1067_v60 = vadd.f32 %v2119_v4, %v2117_v30 }
 0x307   :  { %v2121_v63 = vpop.eup %2120  ;;  %v1925_v25 = vsel %vm327_vm4, %v1863_v15, %v1924_v56  ;;  %v1737_v27 = vmul.f32 %v2115_v29, %v1301_v10 }
 0x308   :  { %v2123_v38 = vpop.eup %2122  ;;  %1068 = vadd.xlane.f32.xlu1 %v1067_v60 }
 0x309   :  { %v2125_v44 = vpop.eup %2124  ;;  %v1867_v62 = vrot.slane %v1737_v27, %v3456_v48 }
 0x30a   :  { %v1304_v23 = vpop.xlane.xlu1 %1303  ;;  %v1073_v21 = vadd.f32 %v2125_v44, %v2123_v38  ;;  %v2127_v16 = vpop.eup %2126 }
 0x30b   :  { %v1926_v51 = vsel %vm329_vm5, %v1867_v62, %v1925_v25  ;;  %v1738_v58 = vmul.f32 %v2121_v63, %v1304_v23 }
 0x30c   :  { %1074 = vadd.xlane.f32.xlu1 %v1073_v21 }
 0x30d   :  { %v1871_v36 = vrot.slane %v1738_v58, %v3456_v48 }
 0x30e   :  { %v1283_v53 = vpop.xlane.xlu1 %1282 }
 0x30f   :  { %v1731_v32 = vmul.f32 %v2127_v16, %v1283_v53  ;;  %v1927_v50 = vsel %vm331_vm6, %v1871_v36, %v1926_v51 }
 0x310   :  { %1330 = vadd.xlane.f32.xlu1 %v1329_v12 }
 0x311   :  { %v1843_v34 = vrot.slane %v1731_v32, %v3456_v48 }
 0x313   :  { %v1921_v20 = vsel %vm333_vm7, %v1843_v34, %v3508_v61 }
 0x314   :  { %v1944_v49 = vsel %vm1940_vm1, %v1921_v20, 0.0 }
 0x315   :  { %1945 = vadd.xlane.f32.xlu1 %v1944_v49 }
 0x364   :  { %v1066_v41 = vpop.xlane.xlu0 %1065 }
 0x365   :  { %2128 = vlog2.f32 %v1066_v41 }
 0x366   :  { %2130 = vrsqrt.f32 %v3566_v7 }
 0x367   :  { %2132 = vrsqrt.f32 %v3510_v5 }
 0x372   :  { %v2129_v46 = vpop.eup %2128 }
 0x373   :  { %v1077_v0 = vmul.f32 0.6931472, %v2129_v46  ;;  %v2131_v59 = vpop.eup %2130 }
 0x374   :  { %v2133_v18 = vpop.eup %2132 }
 0x375   :  { %v1084_v55 = vadd.f32 %v1077_v0, %v3702_v8 }
 0x377   :  { %v1135_v19 = vsub.f32 %v3716_v35, %v1084_v55 }
 0x383   :  { %v1072_v47 = vpop.xlane.xlu0 %1071 }
 0x387   :  { %v1307_v40 = vpop.xlane.xlu0 %1306 }
 0x388   :  { %v1739_v28 = vmul.f32 %v2131_v59, %v1307_v40 }
 0x38a   :  { %v1875_v61 = vrot.slane %v1739_v28, %v3456_v48 }
 0x38b   :  { %v1943_v31 = vpop.xlane.xlu0 %1942 }
 0x38c   :  { %v1954_v43 = vsel %vm1953_vm2, %v1135_v19, %v1943_v31  ;;  %v1928_v7 = vsel %vm333_vm7, %v1875_v61, %v1927_v50 }
 0x38d   :  { %1959 = vst.msk [vmem:[%s3846_s9] sm:$0xff] %vm1958_vm3, %v1954_v43  ;;  %v1947_v8 = vsel %vm1940_vm1, %v1928_v7, 0.0 }
 0x38e   :  { %1948 = vadd.xlane.f32.xlu0 %v1947_v8 }
 0x391   :  { %v1069_v35 = vpop.xlane.xlu1 %1068 }
 0x392   :  { %2134 = vlog2.f32 %v1069_v35 }
 0x393   :  { %2136 = vlog2.f32 %v1072_v47 }
 0x395   :  { %v1075_v14 = vpop.xlane.xlu1 %1074 }
 0x396   :  { %2138 = vlog2.f32 %v1075_v14 }
 0x399   :  { %v1331_v6 = vpop.xlane.xlu1 %1330 }
 0x39a   :  { %v1747_v26 = vmul.f32 %v2133_v18, %v1331_v6 }
 0x39c   :  { %v1907_v5 = vrot.slane %v1747_v26, %v3456_v48 }
 0x39e   :  { %v1935_v54 = vsel %vm333_vm7, %v1907_v5, %v3780_v42  ;;  %v1946_v29 = vpop.xlane.xlu1 %1945 }
 0x39f   :  { %v2135_v13 = vpop.eup %2134  ;;  %v1950_v33 = vsel %vm1940_vm1, %v1935_v54, 0.0 }
 0x3a0   :  { %v1079_v24 = vmul.f32 0.6931472, %v2135_v13  ;;  %1951 = vadd.xlane.f32.xlu1 %v1950_v33  ;;  %v2137_v48 = vpop.eup %2136 }
 0x3a1   :  { %v1081_v42 = vmul.f32 0.6931472, %v2137_v48 }
 0x3a2   :  { %v1085_v39 = vadd.f32 %v1079_v24, %v3738_v57 }
 0x3a3   :  { %v1086_v9 = vadd.f32 %v1081_v42, %v3718_v3 }
 0x3a4   :  { %v1136_v11 = vsub.f32 %v3727_v22, %v1085_v39  ;;  %v2139_v22 = vpop.eup %2138 }
 0x3a5   :  { %v1137_v30 = vsub.f32 %v3725_v1, %v1086_v9  ;;  %v1083_v15 = vmul.f32 0.6931472, %v2139_v22 }
 0x3a6   :  { %v1955_v56 = vsel %vm1953_vm2, %v1136_v11, %v1946_v29 }
 0x3a7   :  { %1960 = vst.msk [vmem:[%s3846_s9 + $0x8] sm:$0xff] %vm1958_vm3, %v1955_v56  ;;  %v1087_v10 = vadd.f32 %v1083_v15, %v3750_v52 }
 0x3a9   :  { %v1138_v60 = vsub.f32 %v3731_v17, %v1087_v10 }
 0x417   :  { %v1949_v4 = vpop.xlane.xlu0 %1948 }
 0x418   :  { %v1956_v57 = vsel %vm1953_vm2, %v1137_v30, %v1949_v4 }
 0x419   :  { %1961 = vst.msk [vmem:[%s3846_s9 + $0x10] sm:$0xff] %vm1958_vm3, %v1956_v57 }
 0x429   :  { %v1952_v63 = vpop.xlane.xlu1 %1951 }
 0x42a   :  { %v1957_v25 = vsel %vm1953_vm2, %v1138_v60, %v1952_v63 }
 0x42b   :  { %1962 = vst.msk [vmem:[%s3846_s9 + $0x18] sm:$0xff] %vm1958_vm3, %v1957_v25 }

</bundles_post_ra>
